<compile_context>
chip_gen: v6e
topology: v6e:2x2x1
jax: 0.10.0
libtpu: 0.0.40
codegen_flags: <defaults>
</compile_context>

<pallas_src>
import functools

import jax
import jax.numpy as jnp
from jax.experimental import pallas as pl
from jax.experimental.pallas import tpu as pltpu

# Module hyper-parameters (g_dim / z_size fixed by the module; the two undefined
# globals chosen small + alignment friendly so z_size + game_state_dim = 128).
G_DIM = 256
Z_SIZE = 100
GAME_STATE_DIM = 28
IN_DIM = Z_SIZE + GAME_STATE_DIM   # 128 — exactly one lane group
KEYS_SIZE = 16
OUT_PAD = 128                      # head padded to a lane-dense 128-wide output
BN_EPS = 0.8                       # BatchNorm1d(out_feat, 0.8) -> eps = 0.8


def _leaky_relu(x, slope=0.2):
    return jnp.maximum(x, slope * x)


def _round_up(x, m):
    return (x + m - 1) // m * m


def generator_kernel(x_ref, w1_ref, b1_ref, w2_ref, b2_ref,
                     w3_ref, b3_ref, w4_ref, b4_ref, out_ref):
    """One row-tile of the generator MLP; weights stay VMEM-resident across the grid."""
    # Block 1: Linear(128 -> 256) + LeakyReLU(0.2)  (no BN).  Single K=128 MXU pass.
    h = jnp.dot(x_ref[...], w1_ref[...],
                preferred_element_type=jnp.float32) + b1_ref[...]
    h = _leaky_relu(h)

    # Block 2: Linear(256 -> 512) with eval-mode BN folded into (w2, b2) + LeakyReLU.
    h = jnp.dot(h.astype(jnp.bfloat16), w2_ref[...],
                preferred_element_type=jnp.float32) + b2_ref[...]
    h = _leaky_relu(h)

    # Block 3: Linear(512 -> 1024) with BN folded + LeakyReLU.
    h = jnp.dot(h.astype(jnp.bfloat16), w3_ref[...],
                preferred_element_type=jnp.float32) + b3_ref[...]
    h = _leaky_relu(h)

    # Head: Linear(1024 -> 128 padded) + tanh; cols >= KEYS_SIZE are zero-padded so the
    # store is a full-lane unmasked bf16 write.
    h = jnp.dot(h.astype(jnp.bfloat16), w4_ref[...],
                preferred_element_type=jnp.float32) + b4_ref[...]
    out_ref[...] = jnp.tanh(h).astype(out_ref.dtype)


def init_params(key):
    """PyTorch-style init U(-1/sqrt(fan_in), +1/sqrt(fan_in)); BN folded; bf16 weights."""
    dims = [(IN_DIM, G_DIM),
            (G_DIM, 2 * G_DIM),
            (2 * G_DIM, 4 * G_DIM),
            (4 * G_DIM, KEYS_SIZE)]
    raw = {}
    for i, (fin, fout) in enumerate(dims, start=1):
        key, kw, kb = jax.random.split(key, 3)
        bound = 1.0 / float(fin) ** 0.5
        # stored pre-transposed: (in, out) so the kernel does x @ W
        raw[f"w{i}"] = jax.random.uniform(kw, (fin, fout), jnp.float32, -bound, bound)
        raw[f"b{i}"] = jax.random.uniform(kb, (1, fout), jnp.float32, -bound, bound)

    # Eval-mode BatchNorm1d (blocks 2, 3): gamma=1, beta=0, running_mean=0, running_var=1.
    # Fold the resulting per-feature affine directly into the preceding Linear.
    for i, fout in [(2, 2 * G_DIM), (3, 4 * G_DIM)]:
        gamma = jnp.ones((1, fout), jnp.float32)
        beta = jnp.zeros((1, fout), jnp.float32)
        running_mean = jnp.zeros((1, fout), jnp.float32)
        running_var = jnp.ones((1, fout), jnp.float32)
        scale = gamma / jnp.sqrt(running_var + BN_EPS)
        shift = beta - running_mean * scale
        raw[f"w{i}"] = raw[f"w{i}"] * scale               # column scale
        raw[f"b{i}"] = raw[f"b{i}"] * scale + shift

    # Pad the 16-wide head to a lane-dense 128-wide output (zeros sliced off later).
    w4 = jnp.zeros((4 * G_DIM, OUT_PAD), jnp.float32).at[:, :KEYS_SIZE].set(raw["w4"])
    b4 = jnp.zeros((1, OUT_PAD), jnp.float32).at[:, :KEYS_SIZE].set(raw["b4"])

    return {
        "w1": raw["w1"].astype(jnp.bfloat16), "b1": raw["b1"],
        "w2": raw["w2"].astype(jnp.bfloat16), "b2": raw["b2"],
        "w3": raw["w3"].astype(jnp.bfloat16), "b3": raw["b3"],
        "w4": w4.astype(jnp.bfloat16), "b4": b4,
    }


def _choose_tiling(batch, tile_b):
    """Pick (row_tile, padded_batch): 16-row aligned, bounded pad waste, >=2 grid steps
    for non-tiny batches so v7x's two TensorCores both get work."""
    n_tiles = max(pl.cdiv(batch, tile_b), min(2, pl.cdiv(batch, 16)))
    tb = _round_up(pl.cdiv(batch, n_tiles), 16)
    return tb, tb * n_tiles


@functools.partial(jax.jit, static_argnames=("tile_b",))
def generator_forward(z, game_state, params, *, tile_b=512):
    """Run the fused Pallas generator kernel over a batch grid."""
    batch = z.shape[0]
    tb, b_pad = _choose_tiling(batch, tile_b)

    # Wrapper-side concat -> one lane-exact K=128 bf16 input (costs B*256 bytes of HBM).
    x = jnp.concatenate([z, game_state], axis=1).astype(jnp.bfloat16)
    if b_pad != batch:
        x = jnp.pad(x, ((0, b_pad - batch), (0, 0)))

    def resident(shape):
        # Constant block index -> weight/bias stays VMEM-resident across grid steps.
        return pl.BlockSpec(shape, lambda i: (0, 0))

    flops_per_row = 2 * (IN_DIM * G_DIM
                         + G_DIM * 2 * G_DIM
                         + 2 * G_DIM * 4 * G_DIM
                         + 4 * G_DIM * OUT_PAD)
    weight_bytes = 2 * (IN_DIM * G_DIM + G_DIM * 2 * G_DIM
                        + 2 * G_DIM * 4 * G_DIM + 4 * G_DIM * OUT_PAD) \
                   + 4 * (G_DIM + 2 * G_DIM + 4 * G_DIM + OUT_PAD)
    cost = pl.CostEstimate(
        flops=b_pad * flops_per_row,
        transcendentals=b_pad * OUT_PAD,
        bytes_accessed=b_pad * (IN_DIM * 2 + OUT_PAD * 2) + weight_bytes)

    out = pl.pallas_call(
        generator_kernel,
        out_shape=jax.ShapeDtypeStruct((b_pad, OUT_PAD), jnp.bfloat16),
        grid=(b_pad // tb,),
        in_specs=[
            pl.BlockSpec((tb, IN_DIM), lambda i: (i, 0)),
            resident(params["w1"].shape), resident(params["b1"].shape),
            resident(params["w2"].shape), resident(params["b2"].shape),
            resident(params["w3"].shape), resident(params["b3"].shape),
            resident(params["w4"].shape), resident(params["b4"].shape),
        ],
        out_specs=pl.BlockSpec((tb, OUT_PAD), lambda i: (i, 0)),
        compiler_params=pltpu.CompilerParams(
            dimension_semantics=("parallel",)),
        cost_estimate=cost,
    )(x,
      params["w1"], params["b1"],
      params["w2"], params["b2"],
      params["w3"], params["b3"],
      params["w4"], params["b4"])

    return out[:batch, :KEYS_SIZE].astype(jnp.float32)


def generator_reference(z, game_state, params):
    """Pure-JAX reference using the same bf16 weights / f32 accumulation path."""
    x = jnp.concatenate([z, game_state], axis=1).astype(jnp.bfloat16)
    h = jnp.dot(x, params["w1"], preferred_element_type=jnp.float32) + params["b1"]
    h = _leaky_relu(h)
    h = jnp.dot(h.astype(jnp.bfloat16), params["w2"],
                preferred_element_type=jnp.float32) + params["b2"]
    h = _leaky_relu(h)
    h = jnp.dot(h.astype(jnp.bfloat16), params["w3"],
                preferred_element_type=jnp.float32) + params["b3"]
    h = _leaky_relu(h)
    h = jnp.dot(h.astype(jnp.bfloat16), params["w4"],
                preferred_element_type=jnp.float32) + params["b4"]
    return jnp.tanh(h)[:, :KEYS_SIZE]


if __name__ == "__main__":
    key = jax.random.PRNGKey(0)
    kp, kz, kg = jax.random.split(key, 3)

    params = init_params(kp)

    batch = 8
    # z ~ U(-1, 1) as in Generator.generate; game_state is an arbitrary float input.
    z = jax.random.uniform(kz, (batch, Z_SIZE), jnp.float32, -1.0, 1.0)
    game_state = jax.random.normal(kg, (batch, GAME_STATE_DIM), jnp.float32)

    out = generator_forward(z, game_state, params)
    out = jax.block_until_ready(out)

    ref = generator_reference(z, game_state, params)
    assert out.shape == (batch, KEYS_SIZE)
    assert jnp.allclose(out, ref, atol=2e-2, rtol=2e-2), "mismatch vs JAX reference"

    print("KERNEL_OK")
</pallas_src>

<mosaic_0001>
module attributes {stable_mosaic.version = 11 : i64} {
  func.func @generator_kernel(%arg0: i32, %arg1: memref<16x128xbf16, #tpu.memory_space<vmem>>, %arg2: memref<128x256xbf16, #tpu.memory_space<vmem>>, %arg3: memref<1x256xf32, #tpu.memory_space<vmem>>, %arg4: memref<256x512xbf16, #tpu.memory_space<vmem>>, %arg5: memref<1x512xf32, #tpu.memory_space<vmem>>, %arg6: memref<512x1024xbf16, #tpu.memory_space<vmem>>, %arg7: memref<1x1024xf32, #tpu.memory_space<vmem>>, %arg8: memref<1024x128xbf16, #tpu.memory_space<vmem>>, %arg9: memref<1x128xf32, #tpu.memory_space<vmem>>, %arg10: memref<16x128xbf16, #tpu.memory_space<vmem>>) attributes {dimension_semantics = [#tpu.dimension_semantics<parallel>], iteration_bounds = array<i64: 1>, scalar_prefetch = 0 : i64, scratch_operands = 0 : i64, tpu.core_type = #tpu.core_type<tc>, window_params = [{transform_indices = @transform_0, window_bounds = array<i64: 16, 128>}, {pipeline_mode = #tpu.pipeline_mode<synchronous>, transform_indices = @transform_1, window_bounds = array<i64: 128, 256>}, {pipeline_mode = #tpu.pipeline_mode<synchronous>, transform_indices = @transform_2, window_bounds = array<i64: 1, 256>}, {pipeline_mode = #tpu.pipeline_mode<synchronous>, transform_indices = @transform_3, window_bounds = array<i64: 256, 512>}, {pipeline_mode = #tpu.pipeline_mode<synchronous>, transform_indices = @transform_4, window_bounds = array<i64: 1, 512>}, {pipeline_mode = #tpu.pipeline_mode<synchronous>, transform_indices = @transform_5, window_bounds = array<i64: 512, 1024>}, {pipeline_mode = #tpu.pipeline_mode<synchronous>, transform_indices = @transform_6, window_bounds = array<i64: 1, 1024>}, {pipeline_mode = #tpu.pipeline_mode<synchronous>, transform_indices = @transform_7, window_bounds = array<i64: 1024, 128>}, {pipeline_mode = #tpu.pipeline_mode<synchronous>, transform_indices = @transform_8, window_bounds = array<i64: 1, 128>}, {transform_indices = @transform_9, window_bounds = array<i64: 16, 128>}]} {
    %c0 = arith.constant 0 : index
    %c0_0 = arith.constant 0 : index
    %0 = vector.load %arg1[%c0, %c0_0] : memref<16x128xbf16, #tpu.memory_space<vmem>>, vector<16x128xbf16>
    %c0_1 = arith.constant 0 : index
    %c0_2 = arith.constant 0 : index
    %1 = vector.load %arg2[%c0_1, %c0_2] : memref<128x256xbf16, #tpu.memory_space<vmem>>, vector<128x256xbf16>
    %cst = arith.constant dense<0.000000e+00> : vector<16x256xf32>
    %2 = tpu.matmul %0, %1, %cst {dimension_numbers = #tpu.dot_dimension_numbers<[1], [0], [0], [1], [0, 0, 1, 1], [], []>} : vector<16x128xbf16>, vector<128x256xbf16>, vector<16x256xf32> -> vector<16x256xf32>
    %c0_3 = arith.constant 0 : index
    %c0_4 = arith.constant 0 : index
    %3 = vector.load %arg3[%c0_3, %c0_4] : memref<1x256xf32, #tpu.memory_space<vmem>>, vector<1x256xf32>
    %4 = vector.broadcast %3 : vector<1x256xf32> to vector<16x256xf32>
    %5 = arith.addf %2, %4 : vector<16x256xf32>
    %cst_5 = arith.constant 2.000000e-01 : f32
    %6 = vector.broadcast %cst_5 : f32 to vector<16x256xf32>
    %7 = arith.mulf %6, %5 : vector<16x256xf32>
    %8 = arith.maximumf %5, %7 : vector<16x256xf32>
    %9 = arith.truncf %8 : vector<16x256xf32> to vector<16x256xbf16>
    %c0_6 = arith.constant 0 : index
    %c0_7 = arith.constant 0 : index
    %10 = vector.load %arg4[%c0_6, %c0_7] : memref<256x512xbf16, #tpu.memory_space<vmem>>, vector<256x512xbf16>
    %cst_8 = arith.constant dense<0.000000e+00> : vector<16x512xf32>
    %11 = tpu.matmul %9, %10, %cst_8 {dimension_numbers = #tpu.dot_dimension_numbers<[1], [0], [0], [1], [0, 0, 1, 1], [], []>} : vector<16x256xbf16>, vector<256x512xbf16>, vector<16x512xf32> -> vector<16x512xf32>
    %c0_9 = arith.constant 0 : index
    %c0_10 = arith.constant 0 : index
    %12 = vector.load %arg5[%c0_9, %c0_10] : memref<1x512xf32, #tpu.memory_space<vmem>>, vector<1x512xf32>
    %13 = vector.broadcast %12 : vector<1x512xf32> to vector<16x512xf32>
    %14 = arith.addf %11, %13 : vector<16x512xf32>
    %cst_11 = arith.constant 2.000000e-01 : f32
    %15 = vector.broadcast %cst_11 : f32 to vector<16x512xf32>
    %16 = arith.mulf %15, %14 : vector<16x512xf32>
    %17 = arith.maximumf %14, %16 : vector<16x512xf32>
    %18 = arith.truncf %17 : vector<16x512xf32> to vector<16x512xbf16>
    %c0_12 = arith.constant 0 : index
    %c0_13 = arith.constant 0 : index
    %19 = vector.load %arg6[%c0_12, %c0_13] : memref<512x1024xbf16, #tpu.memory_space<vmem>>, vector<512x1024xbf16>
    %cst_14 = arith.constant dense<0.000000e+00> : vector<16x1024xf32>
    %20 = tpu.matmul %18, %19, %cst_14 {dimension_numbers = #tpu.dot_dimension_numbers<[1], [0], [0], [1], [0, 0, 1, 1], [], []>} : vector<16x512xbf16>, vector<512x1024xbf16>, vector<16x1024xf32> -> vector<16x1024xf32>
    %c0_15 = arith.constant 0 : index
    %c0_16 = arith.constant 0 : index
    %21 = vector.load %arg7[%c0_15, %c0_16] : memref<1x1024xf32, #tpu.memory_space<vmem>>, vector<1x1024xf32>
    %22 = vector.broadcast %21 : vector<1x1024xf32> to vector<16x1024xf32>
    %23 = arith.addf %20, %22 : vector<16x1024xf32>
    %cst_17 = arith.constant 2.000000e-01 : f32
    %24 = vector.broadcast %cst_17 : f32 to vector<16x1024xf32>
    %25 = arith.mulf %24, %23 : vector<16x1024xf32>
    %26 = arith.maximumf %23, %25 : vector<16x1024xf32>
    %27 = arith.truncf %26 : vector<16x1024xf32> to vector<16x1024xbf16>
    %c0_18 = arith.constant 0 : index
    %c0_19 = arith.constant 0 : index
    %28 = vector.load %arg8[%c0_18, %c0_19] : memref<1024x128xbf16, #tpu.memory_space<vmem>>, vector<1024x128xbf16>
    %cst_20 = arith.constant dense<0.000000e+00> : vector<16x128xf32>
    %29 = tpu.matmul %27, %28, %cst_20 {dimension_numbers = #tpu.dot_dimension_numbers<[1], [0], [0], [1], [0, 0, 1, 1], [], []>} : vector<16x1024xbf16>, vector<1024x128xbf16>, vector<16x128xf32> -> vector<16x128xf32>
    %c0_21 = arith.constant 0 : index
    %c0_22 = arith.constant 0 : index
    %30 = vector.load %arg9[%c0_21, %c0_22] : memref<1x128xf32, #tpu.memory_space<vmem>>, vector<1x128xf32>
    %31 = vector.broadcast %30 : vector<1x128xf32> to vector<16x128xf32>
    %32 = arith.addf %29, %31 : vector<16x128xf32>
    %33 = math.tanh %32 : vector<16x128xf32>
    %34 = arith.truncf %33 : vector<16x128xf32> to vector<16x128xbf16>
    %c0_23 = arith.constant 0 : index
    %c0_24 = arith.constant 0 : index
    %35 = vector.load %arg10[%c0_23, %c0_24] : memref<16x128xbf16, #tpu.memory_space<vmem>>, vector<16x128xbf16>
    tpu.vector_store %arg10[%c0_23, %c0_24], %34 {strides = array<i32>} : memref<16x128xbf16, #tpu.memory_space<vmem>>, vector<16x128xbf16>,
    return
  }
  func.func @transform_0(%arg0: i32) -> (i32, i32) {
    %c0_i32 = arith.constant 0 : i32
    %c0_i32_0 = arith.constant 0 : i32
    return %arg0, %c0_i32 : i32, i32
  }
  func.func @transform_1(%arg0: i32) -> (i32, i32) {
    %c0_i32 = arith.constant 0 : i32
    %c0_i32_0 = arith.constant 0 : i32
    %c0_i32_1 = arith.constant 0 : i32
    return %c0_i32, %c0_i32_0 : i32, i32
  }
  func.func @transform_2(%arg0: i32) -> (i32, i32) {
    %c0_i32 = arith.constant 0 : i32
    %c0_i32_0 = arith.constant 0 : i32
    %c0_i32_1 = arith.constant 0 : i32
    return %c0_i32, %c0_i32_0 : i32, i32
  }
  func.func @transform_3(%arg0: i32) -> (i32, i32) {
    %c0_i32 = arith.constant 0 : i32
    %c0_i32_0 = arith.constant 0 : i32
    %c0_i32_1 = arith.constant 0 : i32
    return %c0_i32, %c0_i32_0 : i32, i32
  }
  func.func @transform_4(%arg0: i32) -> (i32, i32) {
    %c0_i32 = arith.constant 0 : i32
    %c0_i32_0 = arith.constant 0 : i32
    %c0_i32_1 = arith.constant 0 : i32
    return %c0_i32, %c0_i32_0 : i32, i32
  }
  func.func @transform_5(%arg0: i32) -> (i32, i32) {
    %c0_i32 = arith.constant 0 : i32
    %c0_i32_0 = arith.constant 0 : i32
    %c0_i32_1 = arith.constant 0 : i32
    return %c0_i32, %c0_i32_0 : i32, i32
  }
  func.func @transform_6(%arg0: i32) -> (i32, i32) {
    %c0_i32 = arith.constant 0 : i32
    %c0_i32_0 = arith.constant 0 : i32
    %c0_i32_1 = arith.constant 0 : i32
    return %c0_i32, %c0_i32_0 : i32, i32
  }
  func.func @transform_7(%arg0: i32) -> (i32, i32) {
    %c0_i32 = arith.constant 0 : i32
    %c0_i32_0 = arith.constant 0 : i32
    %c0_i32_1 = arith.constant 0 : i32
    return %c0_i32, %c0_i32_0 : i32, i32
  }
  func.func @transform_8(%arg0: i32) -> (i32, i32) {
    %c0_i32 = arith.constant 0 : i32
    %c0_i32_0 = arith.constant 0 : i32
    %c0_i32_1 = arith.constant 0 : i32
    return %c0_i32, %c0_i32_0 : i32, i32
  }
  func.func @transform_9(%arg0: i32) -> (i32, i32) {
    %c0_i32 = arith.constant 0 : i32
    %c0_i32_0 = arith.constant 0 : i32
    return %arg0, %c0_i32 : i32, i32
  }
}

</mosaic_0001>

<bundles_post_ra>
// kernel: generator_forward.1
= control target key start
LH: loop header
LB: loop body
LE: loop exit
PB: predicated region body
PF: predicated region fallthrough
CT: control target
= control target key end

     0   :  { %14 = vsyncpa [#allocation3], 0  ;;  %s4391_s0 = inlined_call_operand.vmem [shape: bf16[16,128], index: 0, kind: input, shape index: {}]   ;;  %s4392_s1 = inlined_call_operand.hbm [shape: bf16[128,256], index: 1, kind: input, shape index: {}]   ;;  %s4393_s2 = inlined_call_operand.vmem [shape: f32[1,256], index: 2, kind: input, shape index: {}]   ;;  %s4394_s3 = inlined_call_operand.hbm [shape: bf16[256,512], index: 3, kind: input, shape index: {}]   ;;  %s4395_s4 = inlined_call_operand.vmem [shape: f32[1,512], index: 4, kind: input, shape index: {}]   ;;  %s4396_s5 = inlined_call_operand.hbm [shape: bf16[512,1024], index: 5, kind: input, shape index: {}]   ;;  %s4397_s6 = inlined_call_operand.vmem [shape: f32[1,1024], index: 6, kind: input, shape index: {}]   ;;  %s4398_s7 = inlined_call_operand.hbm [shape: bf16[1024,128], index: 7, kind: input, shape index: {}]   ;;  %s4399_s8 = inlined_call_operand.vmem [shape: f32[1,128], index: 8, kind: input, shape index: {}]   ;;  %s4400_s9 = inlined_call_operand.vmem [shape: bf16[16,128], index: 9, kind: output, shape index: {}]  }
   0x1   :  { %15 = vsyncpa [#allocation5], 0 }
   0x2   :  { %16 = vsyncpa [#allocation8], 0  ;;  %s4220_s30 = smov [#allocation4]  }
   0x3   :  { %s38_s10 = sshll.u32 %s4220_s30, 4  ;;  %s39_s10 = int_to_ptr.vmem [resolvable:$true] %s38_s10 }
   0x4   :  { %s4142_s11 = scalar_lea.vmem %s39_s10, 8192  ;;  %p4147_p1 = scmp.lt.s32.totalorder %s39_s10, %s39_s10 }
   0x5   :  { %p4143_p0 = scmp.ne.s32.totalorder %s39_s10, %s4142_s11  ;;  %p4148_p2 = scmp.lt.s32.totalorder %s4142_s11, %s4142_s11 }
   0x7   :  { %p4149_p3 = por %p4148_p2, %p4147_p1 }
   0x9   :  { %p4150_p4 = pnand %p4149_p3, %p4143_p0 }
   0xb   :  { %4153 = shalt.err (!%p4150_p4)
}
   0xc   :  { %s4221_s12 = smov 256   ;;  %s4222_s13 = smov 16  }
   0xd   :  { %44 = dma.hbm_to_vmem [thread:$0]  %s4394_s3, 8192, %s39_s10, [#allocation5], %s4221_s12, %s4221_s12, %s4222_s13  }
   0xe   :  { %s4223_s16 = smov [#allocation2]  }
   0xf   :  { %s24_s17 = sshll.u32 %s4223_s16, 4  ;;  %s25_s17 = int_to_ptr.vmem [resolvable:$true] %s24_s17 }
  0x10   :  { %s4162_s18 = scalar_lea.vmem %s25_s17, 2048  ;;  %p4167_p6 = scmp.lt.s32.totalorder %s25_s17, %s25_s17 }
  0x11   :  { %p4163_p5 = scmp.ne.s32.totalorder %s25_s17, %s4162_s18  ;;  %p4168_p7 = scmp.lt.s32.totalorder %s4162_s18, %s4162_s18 }
  0x13   :  { %p4169_p8 = por %p4168_p7, %p4167_p6 }
  0x15   :  { %p4170_p9 = pnand %p4169_p8, %p4163_p5 }
  0x17   :  { %4173 = shalt.err (!%p4170_p9)
}
  0x18   :  { %s4224_s19 = smov 128   ;;  %s4225_s20 = smov 8  }
  0x19   :  { %30 = dma.hbm_to_vmem [thread:$0]  %s4392_s1, 2048, %s25_s17, [#allocation3], %s4224_s19, %s4224_s19, %s4225_s20  }
  0x1a   :  { %s4226_s23 = smov [#allocation6]  }
  0x1b   :  { %s52_s24 = sshll.u32 %s4226_s23, 4  ;;  %s53_s24 = int_to_ptr.vmem [resolvable:$true] %s52_s24 }
  0x1c   :  { %s4182_s3 = scalar_lea.vmem %s53_s24, 32768  ;;  %p4187_p11 = scmp.lt.s32.totalorder %s53_s24, %s53_s24 }
  0x1d   :  { %p4183_p10 = scmp.ne.s32.totalorder %s53_s24, %s4182_s3  ;;  %p4188_p12 = scmp.lt.s32.totalorder %s4182_s3, %s4182_s3 }
  0x1f   :  { %p4189_p13 = por %p4188_p12, %p4187_p11 }
  0x21   :  { %p4190_p0 = pnand %p4189_p13, %p4183_p10 }
  0x23   :  { %4193 = shalt.err (!%p4190_p0)
}
  0x24   :  { %s4227_s25 = smov 512   ;;  %s4228_s26 = smov 32  }
  0x25   :  { %58 = dma.hbm_to_vmem [thread:$0]  %s4396_s5, 32768, %s53_s24, [#allocation5], %s4227_s25, %s4227_s25, %s4228_s26  }
  0x26   :  { %s4229_s29 = smov [#allocation7]  }
  0x27   :  { %s66_s30 = sshll.u32 %s4229_s29, 4  ;;  %s67_s30 = int_to_ptr.vmem [resolvable:$true] %s66_s30 }
  0x28   :  { %s4202_s1 = scalar_lea.vmem %s67_s30, 8192  ;;  %p4207_p2 = scmp.lt.s32.totalorder %s67_s30, %s67_s30 }
  0x29   :  { %p4203_p1 = scmp.ne.s32.totalorder %s67_s30, %s4202_s1  ;;  %p4208_p3 = scmp.lt.s32.totalorder %s4202_s1, %s4202_s1 }
  0x2b   :  { %p4209_p4 = por %p4208_p3, %p4207_p2 }
  0x2d   :  { %p4210_p5 = pnand %p4209_p4, %p4203_p1 }
  0x2f   :  { %4213 = shalt.err (!%p4210_p5)
}
  0x30   :  { %s4230_s10 = smov 64   ;;  %s4231_s11 = smov 4  }
  0x31   :  { %72 = dma.hbm_to_vmem [thread:$0]  %s4398_s7, 8192, %s67_s30, [#allocation8], %s4230_s10, %s4230_s10, %s4231_s11  }
  0x32   :  { %4214 = dma.done.wait [#allocation3], 2048  }
  0x33   :  { %4215 = vsyncadd [#allocation3], 4294965248 }
  0x34   :  { %4216 = dma.done.wait [#allocation5], 40960  }
  0x35   :  { %4217 = vsyncadd [#allocation5], 4294926336 }
  0x36   :  { %4218 = dma.done.wait [#allocation8], 8192  }
  0x37   :  { %4219 = vsyncadd [#allocation8], 4294959104  ;;  %v4232_v0 = vmov 0   ;;  %v3945_v1 = vld [vmem:[#allocation2 + $0x74] ss:$8 sps:$4 sm:$0xff]   ;;  %v3969_v29 = vld [vmem:[%s4391_s0] sm:$0xff]  }
  0x38   :  { %236 = vmatprep.mubr.bf16.mxu0 %v4232_v0  ;;  %v3947_v2 = vld [vmem:[#allocation2 + $0x70] ss:$8 sps:$4 sm:$0xff]   ;;  %204 = vmatprep.subr.bf16.mxu0 %v3945_v1  ;;  %v3948_v3 = vld [vmem:[#allocation2 + $0x64] ss:$8 sps:$4 sm:$0xff]   ;;  %v3950_v4 = vld [vmem:[#allocation2 + $0x60] ss:$8 sps:$4 sm:$0xff]  }
  0x39   :  { %205 = vmatpush1.bf16.msra.mxu0 %v3947_v2  ;;  %v3951_v5 = vld [vmem:[#allocation2 + $0x54] ss:$8 sps:$4 sm:$0xff]   ;;  %v3953_v6 = vld [vmem:[#allocation2 + $0x50] ss:$8 sps:$4 sm:$0xff]   ;;  %v3954_v7 = vld [vmem:[#allocation2 + $0x44] ss:$8 sps:$4 sm:$0xff]  }
  0x3a   :  { %206 = vmatprep.subr.bf16.mxu0 %v3948_v3  ;;  %v3956_v8 = vld [vmem:[#allocation2 + $0x40] ss:$8 sps:$4 sm:$0xff]   ;;  %v3957_v9 = vld [vmem:[#allocation2 + $0x34] ss:$8 sps:$4 sm:$0xff]   ;;  %v3959_v11 = vld [vmem:[#allocation2 + $0x30] ss:$8 sps:$4 sm:$0xff]  }
  0x3b   :  { %v3970_v10 = vld [vmem:[#allocation4 + $0xe4] ss:$16 sps:$4 sm:$0xff]   ;;  %v3975_v12 = vld [vmem:[#allocation4 + $0xe0] ss:$16 sps:$4 sm:$0xff]   ;;  %v3974_v26 = vld [vmem:[#allocation4 + $0xec] ss:$16 sps:$4 sm:$0xff]  }
  0x3c   :  { %663 = vmatprep.subr.bf16.mxu1 %v3970_v10  ;;  %v3976_v13 = vld [vmem:[#allocation4 + $0xc4] ss:$16 sps:$4 sm:$0xff]   ;;  %v3981_v15 = vld [vmem:[#allocation4 + $0xc0] ss:$16 sps:$4 sm:$0xff]   ;;  %v3972_v30 = vld [vmem:[#allocation4 + $0xe8] ss:$16 sps:$4 sm:$0xff]  }
  0x3d   :  { %207 = vmatpush1.bf16.msra.mxu0 %v3950_v4  ;;  %v3960_v14 = vld [vmem:[#allocation2 + $0x24] ss:$8 sps:$4 sm:$0xff]   ;;  %664 = vmatpush1.bf16.msra.mxu1 %v3975_v12  ;;  %v3962_v17 = vld [vmem:[#allocation2 + $0x20] ss:$8 sps:$4 sm:$0xff]   ;;  %v3963_v18 = vld [vmem:[#allocation2 + $0x14] ss:$8 sps:$4 sm:$0xff]  }
  0x3e   :  { %208 = vmatprep.subr.bf16.mxu0 %v3951_v5  ;;  %665 = vmatprep.subr.bf16.mxu1 %v3976_v13  ;;  %v3982_v16 = vld [vmem:[#allocation4 + $0xa4] ss:$16 sps:$4 sm:$0xff]   ;;  %v3987_v19 = vld [vmem:[#allocation4 + $0xa0] ss:$16 sps:$4 sm:$0xff]   ;;  %v3980_v31 = vld [vmem:[#allocation4 + $0xcc] ss:$16 sps:$4 sm:$0xff]  }
  0x3f   :  { %v3988_v20 = vld [vmem:[#allocation4 + $0x84] ss:$16 sps:$4 sm:$0xff]   ;;  %v3965_v21 = vld [vmem:[#allocation2 + $0x10] ss:$8 sps:$4 sm:$0xff]   ;;  %v3968_v25 = vld [vmem:[#allocation2] ss:$8 sps:$4 sm:$0xff]  }
  0x40   :  { %v3966_v22 = vld [vmem:[#allocation2 + $0x4] ss:$8 sps:$4 sm:$0xff]   ;;  %v3993_v23 = vld [vmem:[#allocation4 + $0x80] ss:$16 sps:$4 sm:$0xff]   ;;  %v3978_v34 = vld [vmem:[#allocation4 + $0xc8] ss:$16 sps:$4 sm:$0xff]  }
  0x41   :  { %209 = vmatpush1.bf16.msra.mxu0 %v3953_v6  ;;  %666 = vmatpush1.bf16.msra.mxu1 %v3981_v15  ;;  %v3994_v24 = vld [vmem:[#allocation4 + $0x64] ss:$16 sps:$4 sm:$0xff]   ;;  %v3999_v27 = vld [vmem:[#allocation4 + $0x60] ss:$16 sps:$4 sm:$0xff]   ;;  %v3986_v35 = vld [vmem:[#allocation4 + $0xac] ss:$16 sps:$4 sm:$0xff]  }
  0x42   :  { %210 = vmatprep.subr.bf16.mxu0 %v3954_v7  ;;  %667 = vmatprep.subr.bf16.mxu1 %v3982_v16  ;;  %v4000_v28 = vld [vmem:[#allocation4 + $0x44] ss:$16 sps:$4 sm:$0xff]   ;;  %v4005_v32 = vld [vmem:[#allocation4 + $0x40] ss:$16 sps:$4 sm:$0xff]   ;;  %v3984_v38 = vld [vmem:[#allocation4 + $0xa8] ss:$16 sps:$4 sm:$0xff]  }
  0x43   :  { %v4006_v33 = vld [vmem:[#allocation4 + $0x24] ss:$16 sps:$4 sm:$0xff]   ;;  %v4011_v36 = vld [vmem:[#allocation4 + $0x20] ss:$16 sps:$4 sm:$0xff]   ;;  %v3992_v39 = vld [vmem:[#allocation4 + $0x8c] ss:$16 sps:$4 sm:$0xff]  }
  0x44   :  { %v4012_v37 = vld [vmem:[#allocation4 + $0x4] ss:$16 sps:$4 sm:$0xff]   ;;  %v4017_v40 = vld [vmem:[#allocation4] ss:$16 sps:$4 sm:$0xff]   ;;  %v3990_v42 = vld [vmem:[#allocation4 + $0x88] ss:$16 sps:$4 sm:$0xff]  }
  0x45   :  { %211 = vmatpush1.bf16.msra.mxu0 %v3956_v8  ;;  %668 = vmatpush1.bf16.msra.mxu1 %v3987_v19  ;;  %v4018_v41 = vld [vmem:[#allocation4 + $0x1e4] ss:$16 sps:$4 sm:$0xff]   ;;  %v3998_v43 = vld [vmem:[#allocation4 + $0x6c] ss:$16 sps:$4 sm:$0xff]   ;;  %v4023_v44 = vld [vmem:[#allocation4 + $0x1e0] ss:$16 sps:$4 sm:$0xff]  }
  0x46   :  { %212 = vmatprep.subr.bf16.mxu0 %v3957_v9  ;;  %669 = vmatprep.subr.bf16.mxu1 %v3988_v20  ;;  %v4024_v45 = vld [vmem:[#allocation4 + $0x1c4] ss:$16 sps:$4 sm:$0xff]   ;;  %v3996_v46 = vld [vmem:[#allocation4 + $0x68] ss:$16 sps:$4 sm:$0xff]   ;;  %v4004_v47 = vld [vmem:[#allocation4 + $0x4c] ss:$16 sps:$4 sm:$0xff]  }
  0x47   :  { %v4029_v48 = vld [vmem:[#allocation4 + $0x1c0] ss:$16 sps:$4 sm:$0xff]   ;;  %v4030_v49 = vld [vmem:[#allocation4 + $0x1a4] ss:$16 sps:$4 sm:$0xff]   ;;  %v4002_v50 = vld [vmem:[#allocation4 + $0x48] ss:$16 sps:$4 sm:$0xff]  }
  0x48   :  { %v4010_v51 = vld [vmem:[#allocation4 + $0x2c] ss:$16 sps:$4 sm:$0xff]   ;;  %v4035_v52 = vld [vmem:[#allocation4 + $0x1a0] ss:$16 sps:$4 sm:$0xff]   ;;  %v4036_v53 = vld [vmem:[#allocation4 + $0x184] ss:$16 sps:$4 sm:$0xff]  }
  0x49   :  { %213 = vmatpush1.bf16.msra.mxu0 %v3959_v11  ;;  %670 = vmatpush1.bf16.msra.mxu1 %v3993_v23  ;;  %v4008_v54 = vld [vmem:[#allocation4 + $0x28] ss:$16 sps:$4 sm:$0xff]   ;;  %v4016_v55 = vld [vmem:[#allocation4 + $0xc] ss:$16 sps:$4 sm:$0xff]   ;;  %v4041_v56 = vld [vmem:[#allocation4 + $0x180] ss:$16 sps:$4 sm:$0xff]  }
  0x4a   :  { %214 = vmatprep.subr.bf16.mxu0 %v3960_v14  ;;  %671 = vmatprep.subr.bf16.mxu1 %v3994_v24  ;;  %v4014_v57 = vld [vmem:[#allocation4 + $0x8] ss:$16 sps:$4 sm:$0xff]   ;;  %v4022_v58 = vld [vmem:[#allocation4 + $0x1ec] ss:$16 sps:$4 sm:$0xff]   ;;  %v4042_v2 = vld [vmem:[#allocation4 + $0x164] ss:$16 sps:$4 sm:$0xff]  }
  0x4b   :  { %v4020_v59 = vld [vmem:[#allocation4 + $0x1e8] ss:$16 sps:$4 sm:$0xff]   ;;  %v4028_v60 = vld [vmem:[#allocation4 + $0x1cc] ss:$16 sps:$4 sm:$0xff]   ;;  %v4047_v5 = vld [vmem:[#allocation4 + $0x160] ss:$16 sps:$4 sm:$0xff]  }
  0x4c   :  { %v4026_v61 = vld [vmem:[#allocation4 + $0x1c8] ss:$16 sps:$4 sm:$0xff]   ;;  %v4034_v62 = vld [vmem:[#allocation4 + $0x1ac] ss:$16 sps:$4 sm:$0xff]   ;;  %v4048_v6 = vld [vmem:[#allocation4 + $0x144] ss:$16 sps:$4 sm:$0xff]  }
  0x4d   :  { %215 = vmatpush1.bf16.msra.mxu0 %v3962_v17  ;;  %672 = vmatpush1.bf16.msra.mxu1 %v3999_v27  ;;  %v4032_v63 = vld [vmem:[#allocation4 + $0x1a8] ss:$16 sps:$4 sm:$0xff]   ;;  %v4040_v0 = vld [vmem:[#allocation4 + $0x18c] ss:$16 sps:$4 sm:$0xff]   ;;  %v4053_v9 = vld [vmem:[#allocation4 + $0x140] ss:$16 sps:$4 sm:$0xff]  }
  0x4e   :  { %216 = vmatprep.subr.bf16.mxu0 %v3963_v18  ;;  %673 = vmatprep.subr.bf16.mxu1 %v4000_v28  ;;  %v4038_v1 = vld [vmem:[#allocation4 + $0x188] ss:$16 sps:$4 sm:$0xff]   ;;  %v4046_v3 = vld [vmem:[#allocation4 + $0x16c] ss:$16 sps:$4 sm:$0xff]   ;;  %v4054_v10 = vld [vmem:[#allocation4 + $0x124] ss:$16 sps:$4 sm:$0xff]  }
  0x4f   :  { %v4044_v4 = vld [vmem:[#allocation4 + $0x168] ss:$16 sps:$4 sm:$0xff]   ;;  %v4052_v7 = vld [vmem:[#allocation4 + $0x14c] ss:$16 sps:$4 sm:$0xff]   ;;  %v4059_v13 = vld [vmem:[#allocation4 + $0x120] ss:$16 sps:$4 sm:$0xff]  }
  0x50   :  { %v4050_v8 = vld [vmem:[#allocation4 + $0x148] ss:$16 sps:$4 sm:$0xff]   ;;  %v4058_v11 = vld [vmem:[#allocation4 + $0x12c] ss:$16 sps:$4 sm:$0xff]   ;;  %v4060_v14 = vld [vmem:[#allocation4 + $0x104] ss:$16 sps:$4 sm:$0xff]  }
  0x51   :  { %217 = vmatpush1.bf16.msra.mxu0 %v3965_v21  ;;  %674 = vmatpush1.bf16.msra.mxu1 %v4005_v32  ;;  %v4056_v12 = vld [vmem:[#allocation4 + $0x128] ss:$16 sps:$4 sm:$0xff]   ;;  %v4064_v15 = vld [vmem:[#allocation4 + $0x10c] ss:$16 sps:$4 sm:$0xff]   ;;  %v4065_v17 = vld [vmem:[#allocation4 + $0x100] ss:$16 sps:$4 sm:$0xff]  }
  0x52   :  { %218 = vmatprep.subr.bf16.mxu0 %v3966_v22  ;;  %675 = vmatprep.subr.bf16.mxu1 %v4006_v33  ;;  %v4062_v16 = vld [vmem:[#allocation4 + $0x108] ss:$16 sps:$4 sm:$0xff]   ;;  %v825_v18 = vld [vmem:[#allocation6 + $0x1c0] sm:$0xff] }
  0x53   :  { %v829_v19 = vld [vmem:[#allocation6 + $0x1e0] sm:$0xff] }
  0x54   :  { %v953_v20 = vld [vmem:[#allocation6 + $0x5c0] sm:$0xff]  ;;  %v3570_v21 = vcombine.low %v825_v18, %v829_v19  ;;  %v3571_v22 = vcombine.high %v825_v18, %v829_v19 }
  0x55   :  { %219 = vmatpush1.bf16.msra.mxu0 %v3968_v25  ;;  %676 = vmatpush1.bf16.msra.mxu1 %v4011_v36  ;;  %v957_v23 = vld [vmem:[#allocation6 + $0x5e0] sm:$0xff] }
  0x56   :  { %706 = vmatprep.subr.bf16.mxu0 %v3974_v26  ;;  %677 = vmatprep.subr.bf16.mxu1 %v4012_v37  ;;  %v3698_v24 = vcombine.low %v953_v20, %v957_v23  ;;  %v3699_v25 = vcombine.high %v953_v20, %v957_v23  ;;  %v108_v26 = vlaneseq  ;;  %v789_v18 = vld [vmem:[#allocation6 + $0xa0] sm:$0xff] }
  0x57   :  { %v913_v19 = vld [vmem:[#allocation6 + $0x480] sm:$0xff] }
  0x58   :  { %237 = vmatmul.mubr.bf16.vlgmr.msra.gmra.mxu0 %v3969_v29  ;;  %v4298_v27 = vshrl.u32 %v108_v26, 7  ;;  %v917_v20 = vld [vmem:[#allocation6 + $0x4a0] sm:$0xff] }
  0x59   :  { %707 = vmatpush1.bf16.msra.mxu0 %v3972_v30  ;;  %678 = vmatpush1.bf16.msra.mxu1 %v4017_v40  ;;  %v106_v30 = vld [vmem:[%s4393_s2] sm:$0x3] }
  0x5a   :  { %708 = vmatprep.subr.bf16.mxu0 %v3980_v31  ;;  %679 = vmatprep.subr.bf16.mxu1 %v4018_v41  ;;  %v4301_v28 = vsub.s32 1, %v4298_v27  ;;  %v4304_v29 = vsub.s32 0, %v4298_v27  ;;  %v781_v26 = vld [vmem:[#allocation6 + $0x60] sm:$0xff] }
  0x5c   :  { %v115_v31 = vrot.slane %v106_v30, %v4301_v28  ;;  %v111_v32 = vrot.slane %v106_v30, %v4304_v29  ;;  %v905_v30 = vld [vmem:[#allocation6 + $0x440] sm:$0xff] }
  0x5d   :  { %709 = vmatpush1.bf16.msra.mxu0 %v3978_v34  ;;  %680 = vmatpush2.bf16.msra.mxu1 %v4023_v44 }
  0x5e   :  { %710 = vmatprep.subr.bf16.mxu0 %v3986_v35  ;;  %681 = vmatprep.subr.bf16.mxu1 %v4024_v45 }
  0x61   :  { %711 = vmatpush1.bf16.msra.mxu0 %v3984_v38  ;;  %682 = vmatpush2.bf16.msra.mxu1 %v4029_v48 }
  0x62   :  { %712 = vmatprep.subr.bf16.mxu0 %v3992_v39  ;;  %683 = vmatprep.subr.bf16.mxu1 %v4030_v49  ;;  %v821_v49 = vld [vmem:[#allocation6 + $0x1a0] sm:$0xff] }
  0x65   :  { %713 = vmatpush1.bf16.msra.mxu0 %v3990_v42  ;;  %684 = vmatpush2.bf16.msra.mxu1 %v4035_v52 }
  0x66   :  { %714 = vmatprep.subr.bf16.mxu0 %v3998_v43  ;;  %685 = vmatprep.subr.bf16.mxu1 %v4036_v53 }
  0x69   :  { %715 = vmatpush1.bf16.msra.mxu0 %v3996_v46  ;;  %686 = vmatpush2.bf16.msra.mxu1 %v4041_v56  ;;  %v817_v46 = vld [vmem:[#allocation6 + $0x180] sm:$0xff] }
  0x6a   :  { %716 = vmatprep.subr.bf16.mxu0 %v4004_v47  ;;  %687 = vmatprep.subr.bf16.mxu1 %v4042_v2  ;;  %v805_v2 = vld [vmem:[#allocation6 + $0x120] sm:$0xff] }
  0x6d   :  { %717 = vmatpush1.bf16.msra.mxu0 %v4002_v50  ;;  %688 = vmatpush2.bf16.msra.mxu1 %v4047_v5  ;;  %v945_v50 = vld [vmem:[#allocation6 + $0x580] sm:$0xff] }
  0x6e   :  { %718 = vmatprep.subr.bf16.mxu0 %v4010_v51  ;;  %689 = vmatprep.subr.bf16.mxu1 %v4048_v6  ;;  %v949_v51 = vld [vmem:[#allocation6 + $0x5a0] sm:$0xff] }
  0x6f   :  { %v3691_v56 = vcombine.high %v945_v50, %v949_v51 }
  0x71   :  { %719 = vmatpush1.bf16.msra.mxu0 %v4008_v54  ;;  %690 = vmatpush2.bf16.msra.mxu1 %v4053_v9  ;;  %v793_v9 = vld [vmem:[#allocation6 + $0xc0] sm:$0xff] }
  0x72   :  { %720 = vmatprep.subr.bf16.mxu0 %v4016_v55  ;;  %691 = vmatprep.subr.bf16.mxu1 %v4054_v10  ;;  %v3563_v55 = vcombine.high %v817_v46, %v821_v49  ;;  %v797_v10 = vld [vmem:[#allocation6 + $0xe0] sm:$0xff] }
  0x75   :  { %721 = vmatpush1.bf16.msra.mxu0 %v4014_v57  ;;  %692 = vmatpush2.bf16.msra.mxu1 %v4059_v13  ;;  %v809_v57 = vld [vmem:[#allocation6 + $0x140] sm:$0xff] }
  0x76   :  { %722 = vmatprep.subr.bf16.mxu0 %v4022_v58  ;;  %693 = vmatprep.subr.bf16.mxu1 %v4060_v14  ;;  %v813_v58 = vld [vmem:[#allocation6 + $0x160] sm:$0xff] }
  0x77   :  { %v3554_v5 = vcombine.low %v809_v57, %v813_v58 }
  0x79   :  { %723 = vmatpush2.bf16.msra.mxu0 %v4020_v59  ;;  %694 = vmatpush2.bf16.msra.mxu1 %v4065_v17  ;;  %v937_v59 = vld [vmem:[#allocation6 + $0x540] sm:$0xff] }
  0x7a   :  { %724 = vmatprep.subr.bf16.mxu0 %v4028_v60  ;;  %2347 = vmatprep.subr.bf16.mxu1 %v3571_v22  ;;  %v941_v60 = vld [vmem:[#allocation6 + $0x560] sm:$0xff] }
  0x7b   :  { %v3682_v6 = vcombine.low %v937_v59, %v941_v60  ;;  %v785_v17 = vld [vmem:[#allocation6 + $0x80] sm:$0xff] }
  0x7c   :  { %v3531_v23 = vcombine.high %v785_v17, %v789_v18 }
  0x7d   :  { %725 = vmatpush2.bf16.msra.mxu0 %v4026_v61  ;;  %v3562_v61 = vcombine.low %v817_v46, %v821_v49  ;;  %v1017_v46 = vld [vmem:[#allocation6 + $0x7c0] sm:$0xff] }
  0x7e   :  { %726 = vmatprep.subr.bf16.mxu0 %v4034_v62  ;;  %v3690_v62 = vcombine.low %v945_v50, %v949_v51 }
  0x81   :  { %727 = vmatpush2.bf16.msra.mxu0 %v4032_v63  ;;  %v3555_v63 = vcombine.high %v809_v57, %v813_v58 }
  0x82   :  { %728 = vmatprep.subr.bf16.mxu0 %v4040_v0  ;;  %v3683_v0 = vcombine.high %v937_v59, %v941_v60  ;;  %v873_v60 = vld [vmem:[#allocation6 + $0x340] sm:$0xff] }
  0x85   :  { %729 = vmatpush2.bf16.msra.mxu0 %v4038_v1  ;;  %v801_v1 = vld [vmem:[#allocation6 + $0x100] sm:$0xff] }
  0x86   :  { %730 = vmatprep.subr.bf16.mxu0 %v4046_v3  ;;  %v929_v3 = vld [vmem:[#allocation6 + $0x500] sm:$0xff]  ;;  %v3546_v13 = vcombine.low %v801_v1, %v805_v2 }
  0x89   :  { %731 = vmatpush2.bf16.msra.mxu0 %v4044_v4  ;;  %v933_v4 = vld [vmem:[#allocation6 + $0x520] sm:$0xff] }
  0x8a   :  { %732 = vmatprep.subr.bf16.mxu0 %v4052_v7  ;;  %v3547_v7 = vcombine.high %v801_v1, %v805_v2  ;;  %v3674_v14 = vcombine.low %v929_v3, %v933_v4 }
  0x8d   :  { %733 = vmatpush2.bf16.msra.mxu0 %v4050_v8  ;;  %v3675_v8 = vcombine.high %v929_v3, %v933_v4  ;;  %v865_v4 = vld [vmem:[#allocation6 + $0x300] sm:$0xff] }
  0x8e   :  { %734 = vmatprep.subr.bf16.mxu0 %v4058_v11  ;;  %v921_v11 = vld [vmem:[#allocation6 + $0x4c0] sm:$0xff] }
  0x91   :  { %735 = vmatpush2.bf16.msra.mxu0 %v4056_v12  ;;  %v925_v12 = vld [vmem:[#allocation6 + $0x4e0] sm:$0xff] }
  0x92   :  { %736 = vmatprep.subr.bf16.mxu0 %v4064_v15  ;;  %v3539_v15 = vcombine.high %v793_v9, %v797_v10  ;;  %v3666_v22 = vcombine.low %v921_v11, %v925_v12 }
  0x95   :  { %737 = vmatpush2.bf16.msra.mxu0 %v4062_v16  ;;  %v3667_v16 = vcombine.high %v921_v11, %v925_v12  ;;  %v857_v12 = vld [vmem:[#allocation6 + $0x2c0] sm:$0xff] }
  0x96   :  { %2390 = vmatprep.subr.bf16.mxu0 %v3699_v25  ;;  %v777_v25 = vld [vmem:[#allocation6 + $0x40] sm:$0xff] }
 0x118   :  { %v238_v33 = vpop.f32.mrf.mxu0 }
 0x119   :  { %v239_v36 = vadd.f32 %v238_v33, %v111_v32  ;;  %v3658_v33 = vcombine.low %v913_v19, %v917_v20 }
 0x11a   :  { %v240_v34 = vpop.f32.mrf.mxu0 }
 0x11b   :  { %v241_v35 = vadd.f32 %v240_v34, %v115_v31  ;;  %v247_v43 = vmul.f32 0.2, %v239_v36  ;;  %v3523_v34 = vcombine.high %v777_v25, %v781_v26 }
 0x11c   :  { %v242_v37 = vpop.f32.mrf.mxu0 }
 0x11d   :  { %v243_v38 = vadd.f32 %v242_v37, %v111_v32  ;;  %v248_v40 = vmul.f32 0.2, %v241_v35  ;;  %v251_v52 = vmax.f32 %v239_v36, %v247_v43  ;;  %v3530_v32 = vcombine.low %v785_v17, %v789_v18  ;;  %v769_v36 = vld [vmem:[#allocation6] sm:$0xff] }
 0x11e   :  { %v244_v39 = vpop.f32.mrf.mxu0  ;;  %v773_v37 = vld [vmem:[#allocation6 + $0x20] sm:$0xff] }
 0x11f   :  { %v249_v41 = vmul.f32 0.2, %v243_v38  ;;  %v245_v42 = vadd.f32 %v244_v39, %v115_v31  ;;  %v252_v47 = vmax.f32 %v241_v35, %v248_v40  ;;  %v909_v31 = vld [vmem:[#allocation6 + $0x460] sm:$0xff]  ;;  %v3522_v40 = vcombine.low %v777_v25, %v781_v26 }
 0x120   :  { %v3651_v35 = vcombine.high %v905_v30, %v909_v31  ;;  %v901_v39 = vld [vmem:[#allocation6 + $0x420] sm:$0xff] }
 0x121   :  { %v250_v44 = vmul.f32 0.2, %v245_v42  ;;  %v253_v45 = vmax.f32 %v243_v38, %v249_v41  ;;  %v897_v38 = vld [vmem:[#allocation6 + $0x400] sm:$0xff]  ;;  %v3650_v41 = vcombine.low %v905_v30, %v909_v31 }
 0x122   :  { %v3643_v43 = vcombine.high %v897_v38, %v901_v39  ;;  %v3642_v49 = vcombine.low %v897_v38, %v901_v39  ;;  %v981_v26 = vld [vmem:[#allocation6 + $0x6a0] sm:$0xff] }
 0x123   :  { %v254_v48 = vmax.f32 %v245_v42, %v250_v44  ;;  %v255_v54 = vpack.c.bf16 %v253_v45, %v251_v52  ;;  %v3515_v42 = vcombine.high %v769_v36, %v773_v37  ;;  %v889_v44 = vld [vmem:[#allocation6 + $0x3c0] sm:$0xff] }
 0x124   :  { %v893_v45 = vld [vmem:[#allocation6 + $0x3e0] sm:$0xff] }
 0x125   :  { %v256_v53 = vpack.c.bf16 %v254_v48, %v252_v47  ;;  %v1021_v47 = vld [vmem:[#allocation6 + $0x7e0] sm:$0xff]  ;;  %v3514_v48 = vcombine.low %v769_v36, %v773_v37  ;;  %v3635_v50 = vcombine.high %v889_v44, %v893_v45 }
 0x126   :  { %v3763_v51 = vcombine.high %v1017_v46, %v1021_v47  ;;  %v881_v52 = vld [vmem:[#allocation6 + $0x380] sm:$0xff]  ;;  %v3762_v57 = vcombine.low %v1017_v46, %v1021_v47 }
 0x127   :  { %695 = vmatprep.mubr.bf16.mxu1 %v256_v53  ;;  %738 = vmatprep.mubr.bf16.mxu0 %v256_v53  ;;  %v885_v53 = vld [vmem:[#allocation6 + $0x3a0] sm:$0xff] }
 0x128   :  { %696 = vmatmul.mubr.bf16.vlgmr.msra.gmra.mxu1 %v255_v54  ;;  %739 = vmatmul.mubr.bf16.vlgmr.msra.gmra.mxu0 %v255_v54  ;;  %v1009_v54 = vld [vmem:[#allocation6 + $0x780] sm:$0xff]  ;;  %v3627_v58 = vcombine.high %v881_v52, %v885_v53 }
 0x129   :  { %2348 = vmatpush1.bf16.msra.mxu1 %v3570_v21  ;;  %2391 = vmatpush1.bf16.msra.mxu0 %v3698_v24  ;;  %v3538_v21 = vcombine.low %v793_v9, %v797_v10  ;;  %v3659_v24 = vcombine.high %v913_v19, %v917_v20  ;;  %v973_v37 = vld [vmem:[#allocation6 + $0x660] sm:$0xff] }
 0x12a   :  { %2349 = vmatprep.subr.bf16.mxu1 %v3563_v55  ;;  %2392 = vmatprep.subr.bf16.mxu0 %v3691_v56  ;;  %v1013_v55 = vld [vmem:[#allocation6 + $0x7a0] sm:$0xff]  ;;  %v3634_v56 = vcombine.low %v889_v44, %v893_v45 }
 0x12b   :  { %v3755_v59 = vcombine.high %v1009_v54, %v1013_v55  ;;  %v3754_v1 = vcombine.low %v1009_v54, %v1013_v55  ;;  %v965_v45 = vld [vmem:[#allocation6 + $0x620] sm:$0xff] }
 0x12d   :  { %2350 = vmatpush1.bf16.msra.mxu1 %v3562_v61  ;;  %2393 = vmatpush1.bf16.msra.mxu0 %v3690_v62  ;;  %v877_v61 = vld [vmem:[#allocation6 + $0x360] sm:$0xff] }
 0x12e   :  { %2351 = vmatprep.subr.bf16.mxu1 %v3555_v63  ;;  %2394 = vmatprep.subr.bf16.mxu0 %v3683_v0  ;;  %v1001_v62 = vld [vmem:[#allocation6 + $0x740] sm:$0xff]  ;;  %v3626_v0 = vcombine.low %v881_v52, %v885_v53  ;;  %v3619_v2 = vcombine.high %v873_v60, %v877_v61  ;;  %v4319_v53 = vld [vmem:[#allocation6 + $0x5e8] sm:$0xff] }
 0x12f   :  { %v1005_v63 = vld [vmem:[#allocation6 + $0x760] sm:$0xff] }
 0x130   :  { %v3747_v3 = vcombine.high %v1001_v62, %v1005_v63  ;;  %v3746_v9 = vcombine.low %v1001_v62, %v1005_v63 }
 0x131   :  { %2352 = vmatpush1.bf16.msra.mxu1 %v3554_v5  ;;  %2395 = vmatpush1.bf16.msra.mxu0 %v3682_v6  ;;  %v869_v5 = vld [vmem:[#allocation6 + $0x320] sm:$0xff] }
 0x132   :  { %2353 = vmatprep.subr.bf16.mxu1 %v3547_v7  ;;  %2396 = vmatprep.subr.bf16.mxu0 %v3675_v8  ;;  %v993_v6 = vld [vmem:[#allocation6 + $0x700] sm:$0xff]  ;;  %v3618_v8 = vcombine.low %v873_v60, %v877_v61  ;;  %v3611_v10 = vcombine.high %v865_v4, %v869_v5 }
 0x133   :  { %v997_v7 = vld [vmem:[#allocation6 + $0x720] sm:$0xff] }
 0x134   :  { %v3739_v11 = vcombine.high %v993_v6, %v997_v7  ;;  %v3738_v17 = vcombine.low %v993_v6, %v997_v7 }
 0x135   :  { %2354 = vmatpush1.bf16.msra.mxu1 %v3546_v13  ;;  %2397 = vmatpush1.bf16.msra.mxu0 %v3674_v14  ;;  %v861_v13 = vld [vmem:[#allocation6 + $0x2e0] sm:$0xff] }
 0x136   :  { %2355 = vmatprep.subr.bf16.mxu1 %v3539_v15  ;;  %2398 = vmatprep.subr.bf16.mxu0 %v3667_v16  ;;  %v985_v14 = vld [vmem:[#allocation6 + $0x6c0] sm:$0xff]  ;;  %v3610_v16 = vcombine.low %v865_v4, %v869_v5  ;;  %v3603_v18 = vcombine.high %v857_v12, %v861_v13  ;;  %v3602_v20 = vcombine.low %v857_v12, %v861_v13 }
 0x137   :  { %v989_v15 = vld [vmem:[#allocation6 + $0x6e0] sm:$0xff] }
 0x138   :  { %v3731_v19 = vcombine.high %v985_v14, %v989_v15 }
 0x139   :  { %2356 = vmatpush1.bf16.msra.mxu1 %v3538_v21  ;;  %2399 = vmatpush1.bf16.msra.mxu0 %v3666_v22  ;;  %v3730_v21 = vcombine.low %v985_v14, %v989_v15  ;;  %v849_v22 = vld [vmem:[#allocation6 + $0x280] sm:$0xff] }
 0x13a   :  { %2357 = vmatprep.subr.bf16.mxu1 %v3531_v23  ;;  %2400 = vmatprep.subr.bf16.mxu0 %v3659_v24  ;;  %v853_v23 = vld [vmem:[#allocation6 + $0x2a0] sm:$0xff] }
 0x13b   :  { %v977_v24 = vld [vmem:[#allocation6 + $0x680] sm:$0xff]  ;;  %v3595_v25 = vcombine.high %v849_v22, %v853_v23  ;;  %v3594_v30 = vcombine.low %v849_v22, %v853_v23 }
 0x13c   :  { %v3722_v31 = vcombine.low %v977_v24, %v981_v26 }
 0x13d   :  { %2358 = vmatpush1.bf16.msra.mxu1 %v3530_v32  ;;  %2401 = vmatpush1.bf16.msra.mxu0 %v3658_v33  ;;  %v3723_v32 = vcombine.high %v977_v24, %v981_v26  ;;  %v841_v33 = vld [vmem:[#allocation6 + $0x240] sm:$0xff] }
 0x13e   :  { %2359 = vmatprep.subr.bf16.mxu1 %v3523_v34  ;;  %2402 = vmatprep.subr.bf16.mxu0 %v3651_v35  ;;  %v845_v34 = vld [vmem:[#allocation6 + $0x260] sm:$0xff] }
 0x13f   :  { %v969_v35 = vld [vmem:[#allocation6 + $0x640] sm:$0xff]  ;;  %v3587_v36 = vcombine.high %v841_v33, %v845_v34  ;;  %v3586_v38 = vcombine.low %v841_v33, %v845_v34  ;;  %v818_v33 = vld [vmem:[#allocation6 + $0x188] sm:$0xff] }
 0x140   :  { %v3714_v39 = vcombine.low %v969_v35, %v973_v37 }
 0x141   :  { %2360 = vmatpush1.bf16.msra.mxu1 %v3522_v40  ;;  %2403 = vmatpush1.bf16.msra.mxu0 %v3650_v41  ;;  %v3715_v40 = vcombine.high %v969_v35, %v973_v37  ;;  %v833_v41 = vld [vmem:[#allocation6 + $0x200] sm:$0xff]  ;;  %v946_v37 = vld [vmem:[#allocation6 + $0x588] sm:$0xff] }
 0x142   :  { %2361 = vmatprep.subr.bf16.mxu1 %v3515_v42  ;;  %2404 = vmatprep.subr.bf16.mxu0 %v3643_v43  ;;  %v837_v42 = vld [vmem:[#allocation6 + $0x220] sm:$0xff] }
 0x143   :  { %v961_v43 = vld [vmem:[#allocation6 + $0x600] sm:$0xff]  ;;  %v3579_v44 = vcombine.high %v833_v41, %v837_v42  ;;  %v3578_v46 = vcombine.low %v833_v41, %v837_v42 }
 0x144   :  { %v3706_v47 = vcombine.low %v961_v43, %v965_v45 }
 0x145   :  { %2362 = vmatpush1.bf16.msra.mxu1 %v3514_v48  ;;  %2405 = vmatpush1.bf16.msra.mxu0 %v3642_v49  ;;  %v3707_v48 = vcombine.high %v961_v43, %v965_v45  ;;  %v4311_v49 = vld [vmem:[#allocation6 + $0x1c8] sm:$0xff] }
 0x146   :  { %2363 = vmatprep.subr.bf16.mxu1 %v3635_v50  ;;  %2406 = vmatprep.subr.bf16.mxu0 %v3763_v51  ;;  %v4313_v50 = vld [vmem:[#allocation6 + $0x1e8] sm:$0xff] }
 0x147   :  { %v4315_v51 = vld [vmem:[#allocation6 + $0x5c8] sm:$0xff]  ;;  %v3573_v52 = vcombine.high %v4311_v49, %v4313_v50  ;;  %v3572_v54 = vcombine.low %v4311_v49, %v4313_v50 }
 0x148   :  { %v3700_v55 = vcombine.low %v4315_v51, %v4319_v53  ;;  %v810_v43 = vld [vmem:[#allocation6 + $0x148] sm:$0xff] }
 0x149   :  { %2364 = vmatpush2.bf16.msra.mxu1 %v3634_v56  ;;  %2407 = vmatpush2.bf16.msra.mxu0 %v3762_v57  ;;  %v3701_v56 = vcombine.high %v4315_v51, %v4319_v53  ;;  %v321_v57 = vld [vmem:[%s4395_s4] sm:$0xf]  ;;  %v802_v53 = vld [vmem:[#allocation6 + $0x108] sm:$0xff] }
 0x14a   :  { %2365 = vmatprep.subr.bf16.mxu1 %v3627_v58  ;;  %2408 = vmatprep.subr.bf16.mxu0 %v3755_v59  ;;  %v337_v58 = vsub.s32 3, %v4298_v27  ;;  %v333_v59 = vsub.s32 2, %v4298_v27  ;;  %v326_v60 = vrot.slane %v321_v57, %v4304_v29  ;;  %v330_v61 = vrot.slane %v321_v57, %v4301_v28 }
 0x14c   :  { %v338_v62 = vrot.slane %v321_v57, %v337_v58 }
 0x14d   :  { %2366 = vmatpush2.bf16.msra.mxu1 %v3626_v0  ;;  %2409 = vmatpush2.bf16.msra.mxu0 %v3754_v1  ;;  %v334_v0 = vrot.slane %v321_v57, %v333_v59  ;;  %v930_v57 = vld [vmem:[#allocation6 + $0x508] sm:$0xff] }
 0x14e   :  { %2367 = vmatprep.subr.bf16.mxu1 %v3619_v2  ;;  %2410 = vmatprep.subr.bf16.mxu0 %v3747_v3 }
 0x151   :  { %2368 = vmatpush2.bf16.msra.mxu1 %v3618_v8  ;;  %2411 = vmatpush2.bf16.msra.mxu0 %v3746_v9 }
 0x152   :  { %2369 = vmatprep.subr.bf16.mxu1 %v3611_v10  ;;  %2412 = vmatprep.subr.bf16.mxu0 %v3739_v11 }
 0x155   :  { %2370 = vmatpush2.bf16.msra.mxu1 %v3610_v16  ;;  %2413 = vmatpush2.bf16.msra.mxu0 %v3738_v17 }
 0x156   :  { %2371 = vmatprep.subr.bf16.mxu1 %v3603_v18  ;;  %2414 = vmatprep.subr.bf16.mxu0 %v3731_v19 }
 0x159   :  { %2372 = vmatpush2.bf16.msra.mxu1 %v3602_v20  ;;  %2415 = vmatpush2.bf16.msra.mxu0 %v3730_v21 }
 0x15a   :  { %2373 = vmatprep.subr.bf16.mxu1 %v3595_v25  ;;  %2416 = vmatprep.subr.bf16.mxu0 %v3723_v32 }
 0x15d   :  { %2374 = vmatpush2.bf16.msra.mxu1 %v3594_v30  ;;  %2417 = vmatpush2.bf16.msra.mxu0 %v3722_v31 }
 0x15e   :  { %2375 = vmatprep.subr.bf16.mxu1 %v3587_v36  ;;  %2418 = vmatprep.subr.bf16.mxu0 %v3715_v40  ;;  %v822_v36 = vld [vmem:[#allocation6 + $0x1a8] sm:$0xff] }
 0x15f   :  { %v3564_v49 = vcombine.low %v818_v33, %v822_v36 }
 0x161   :  { %2376 = vmatpush2.bf16.msra.mxu1 %v3586_v38  ;;  %2419 = vmatpush2.bf16.msra.mxu0 %v3714_v39  ;;  %v950_v38 = vld [vmem:[#allocation6 + $0x5a8] sm:$0xff] }
 0x162   :  { %2377 = vmatprep.subr.bf16.mxu1 %v3579_v44  ;;  %2420 = vmatprep.subr.bf16.mxu0 %v3707_v48  ;;  %v3565_v44 = vcombine.high %v818_v33, %v822_v36  ;;  %v3693_v45 = vcombine.high %v946_v37, %v950_v38  ;;  %v942_v48 = vld [vmem:[#allocation6 + $0x568] sm:$0xff]  ;;  %v3692_v50 = vcombine.low %v946_v37, %v950_v38 }
 0x163   :  { %v1018_v36 = vld [vmem:[#allocation6 + $0x7c8] sm:$0xff] }
 0x164   :  { %v1022_v37 = vld [vmem:[#allocation6 + $0x7e8] sm:$0xff] }
 0x165   :  { %2378 = vmatpush2.bf16.msra.mxu1 %v3578_v46  ;;  %2421 = vmatpush2.bf16.msra.mxu0 %v3706_v47  ;;  %v814_v46 = vld [vmem:[#allocation6 + $0x168] sm:$0xff] }
 0x166   :  { %2433 = vmatprep.subr.bf16.mxu1 %v3573_v52  ;;  %2476 = vmatprep.subr.bf16.mxu0 %v3701_v56  ;;  %v938_v47 = vld [vmem:[#allocation6 + $0x548] sm:$0xff]  ;;  %v3557_v51 = vcombine.high %v810_v43, %v814_v46 }
 0x167   :  { %v3685_v52 = vcombine.high %v938_v47, %v942_v48  ;;  %v806_v56 = vld [vmem:[#allocation6 + $0x128] sm:$0xff] }
 0x1e8   :  { %v697_v63 = vpop.f32.mrf.mxu1  ;;  %v740_v1 = vpop.f32.mrf.mxu0 }
 0x1e9   :  { %v698_v2 = vadd.f32 %v697_v63, %v326_v60  ;;  %v741_v7 = vadd.f32 %v740_v1, %v334_v0  ;;  %v794_v63 = vld [vmem:[#allocation6 + $0xc8] sm:$0xff] }
 0x1ea   :  { %v699_v3 = vpop.f32.mrf.mxu1  ;;  %v742_v4 = vpop.f32.mrf.mxu0  ;;  %v922_v1 = vld [vmem:[#allocation6 + $0x4c8] sm:$0xff] }
 0x1eb   :  { %v700_v5 = vadd.f32 %v699_v3, %v330_v61  ;;  %v743_v6 = vadd.f32 %v742_v4, %v338_v62  ;;  %v749_v10 = vmul.f32 0.2, %v698_v2  ;;  %v751_v19 = vmul.f32 0.2, %v741_v7 }
 0x1ec   :  { %v701_v8 = vpop.f32.mrf.mxu1  ;;  %v744_v9 = vpop.f32.mrf.mxu0  ;;  %v3548_v3 = vcombine.low %v802_v53, %v806_v56 }
 0x1ed   :  { %v702_v11 = vadd.f32 %v701_v8, %v326_v60  ;;  %v745_v12 = vadd.f32 %v744_v9, %v334_v0  ;;  %v750_v15 = vmul.f32 0.2, %v700_v5  ;;  %v752_v16 = vmul.f32 0.2, %v743_v6  ;;  %v934_v60 = vld [vmem:[#allocation6 + $0x528] sm:$0xff] }
 0x1ee   :  { %v703_v13 = vpop.f32.mrf.mxu1  ;;  %v746_v14 = vpop.f32.mrf.mxu0  ;;  %v757_v34 = vmax.f32 %v698_v2, %v749_v10  ;;  %v759_v35 = vmax.f32 %v741_v7, %v751_v19  ;;  %v798_v0 = vld [vmem:[#allocation6 + $0xe8] sm:$0xff]  ;;  %v3676_v4 = vcombine.low %v930_v57, %v934_v60 }
 0x1ef   :  { %v704_v17 = vadd.f32 %v703_v13, %v330_v61  ;;  %v747_v18 = vadd.f32 %v746_v14, %v338_v62  ;;  %v753_v20 = vmul.f32 0.2, %v702_v11  ;;  %v755_v21 = vmul.f32 0.2, %v745_v12  ;;  %v926_v2 = vld [vmem:[#allocation6 + $0x4e8] sm:$0xff] }
 0x1f0   :  { %v758_v26 = vmax.f32 %v700_v5, %v750_v15  ;;  %v760_v30 = vmax.f32 %v743_v6, %v752_v16  ;;  %v3556_v61 = vcombine.low %v810_v43, %v814_v46  ;;  %v3684_v62 = vcombine.low %v938_v47, %v942_v48  ;;  %v786_v7 = vld [vmem:[#allocation6 + $0x88] sm:$0xff] }
 0x1f1   :  { %v754_v22 = vmul.f32 0.2, %v704_v17  ;;  %v756_v23 = vmul.f32 0.2, %v747_v18  ;;  %v761_v24 = vmax.f32 %v702_v11, %v753_v20  ;;  %v763_v25 = vmax.f32 %v745_v12, %v755_v21  ;;  %v790_v8 = vld [vmem:[#allocation6 + $0xa8] sm:$0xff] }
 0x1f2   :  { %v3541_v5 = vcombine.high %v794_v63, %v798_v0  ;;  %v3669_v6 = vcombine.high %v922_v1, %v926_v2  ;;  %v914_v9 = vld [vmem:[#allocation6 + $0x488] sm:$0xff]  ;;  %v3540_v11 = vcombine.low %v794_v63, %v798_v0  ;;  %v3668_v12 = vcombine.low %v922_v1, %v926_v2 }
 0x1f3   :  { %v762_v31 = vmax.f32 %v704_v17, %v754_v22  ;;  %v764_v32 = vmax.f32 %v747_v18, %v756_v23  ;;  %v4342_v41 = vpack.c.bf16 %v761_v24, %v757_v34  ;;  %v4344_v42 = vpack.c.bf16 %v763_v25, %v759_v35  ;;  %v918_v10 = vld [vmem:[#allocation6 + $0x4a8] sm:$0xff] }
 0x1f4   :  { %v3533_v13 = vcombine.high %v786_v7, %v790_v8  ;;  %v3661_v14 = vcombine.high %v914_v9, %v918_v10  ;;  %v778_v15 = vld [vmem:[#allocation6 + $0x48] sm:$0xff]  ;;  %v3532_v19 = vcombine.low %v786_v7, %v790_v8  ;;  %v3660_v20 = vcombine.low %v914_v9, %v918_v10 }
 0x1f5   :  { %v4338_v39 = vpack.c.bf16 %v762_v31, %v758_v26  ;;  %v4340_v40 = vpack.c.bf16 %v764_v32, %v760_v30  ;;  %v782_v16 = vld [vmem:[#allocation6 + $0x68] sm:$0xff] }
 0x1f6   :  { %v906_v17 = vld [vmem:[#allocation6 + $0x448] sm:$0xff]  ;;  %v3525_v21 = vcombine.high %v778_v15, %v782_v16  ;;  %v3524_v30 = vcombine.low %v778_v15, %v782_v16 }
 0x1f7   :  { %2379 = vmatprep.mubr.bf16.mxu1 %v4338_v39  ;;  %2422 = vmatprep.mubr.bf16.mxu0 %v4340_v40  ;;  %v910_v18 = vld [vmem:[#allocation6 + $0x468] sm:$0xff] }
 0x1f8   :  { %2380 = vmatmul.mubr.bf16.vlgmr.msra.gmra.mxu1 %v4342_v41  ;;  %2423 = vmatmul.mubr.bf16.vlgmr.msra.gmra.mxu0 %v4344_v42  ;;  %v3653_v22 = vcombine.high %v906_v17, %v910_v18  ;;  %v770_v23 = vld [vmem:[#allocation6 + $0x8] sm:$0xff]  ;;  %v3652_v31 = vcombine.low %v906_v17, %v910_v18 }
 0x1f9   :  { %2434 = vmatpush1.bf16.msra.mxu1 %v3572_v54  ;;  %2477 = vmatpush1.bf16.msra.mxu0 %v3700_v55  ;;  %v3549_v54 = vcombine.high %v802_v53, %v806_v56  ;;  %v3677_v55 = vcombine.high %v930_v57, %v934_v60  ;;  %v774_v24 = vld [vmem:[#allocation6 + $0x28] sm:$0xff] }
 0x1fa   :  { %2465 = vmatprep.mubr.bf16.mxu1 %v4338_v39  ;;  %2508 = vmatprep.mubr.bf16.mxu0 %v4340_v40  ;;  %v898_v25 = vld [vmem:[#allocation6 + $0x408] sm:$0xff]  ;;  %v3517_v32 = vcombine.high %v770_v23, %v774_v24  ;;  %v3516_v38 = vcombine.low %v770_v23, %v774_v24 }
 0x1fb   :  { %2435 = vmatprep.subr.bf16.mxu1 %v3565_v44  ;;  %2478 = vmatprep.subr.bf16.mxu0 %v3693_v45  ;;  %v902_v26 = vld [vmem:[#allocation6 + $0x428] sm:$0xff]  ;;  %v3765_v45 = vcombine.high %v1018_v36, %v1022_v37 }
 0x1fc   :  { %v3645_v33 = vcombine.high %v898_v25, %v902_v26  ;;  %v890_v34 = vld [vmem:[#allocation6 + $0x3c8] sm:$0xff]  ;;  %v3644_v43 = vcombine.low %v898_v25, %v902_v26 }
 0x1fd   :  { %2436 = vmatpush1.bf16.msra.mxu1 %v3564_v49  ;;  %2479 = vmatpush1.bf16.msra.mxu0 %v3692_v50  ;;  %v894_v35 = vld [vmem:[#allocation6 + $0x3e8] sm:$0xff] }
 0x1fe   :  { %2437 = vmatprep.subr.bf16.mxu1 %v3557_v51  ;;  %2480 = vmatprep.subr.bf16.mxu0 %v3685_v52  ;;  %v3637_v44 = vcombine.high %v890_v34, %v894_v35  ;;  %v882_v46 = vld [vmem:[#allocation6 + $0x388] sm:$0xff]  ;;  %v3636_v50 = vcombine.low %v890_v34, %v894_v35  ;;  %v3764_v51 = vcombine.low %v1018_v36, %v1022_v37 }
 0x1ff   :  { %v886_v47 = vld [vmem:[#allocation6 + $0x3a8] sm:$0xff] }
 0x200   :  { %v1010_v48 = vld [vmem:[#allocation6 + $0x788] sm:$0xff]  ;;  %v3629_v52 = vcombine.high %v882_v46, %v886_v47 }
 0x201   :  { %2438 = vmatpush1.bf16.msra.mxu1 %v3556_v61  ;;  %2481 = vmatpush1.bf16.msra.mxu0 %v3684_v62  ;;  %v1014_v49 = vld [vmem:[#allocation6 + $0x7a8] sm:$0xff]  ;;  %v3628_v62 = vcombine.low %v882_v46, %v886_v47  ;;  %v827_v47 = vld [vmem:[#allocation6 + $0x1d0] sm:$0xff] }
 0x202   :  { %2439 = vmatprep.subr.bf16.mxu1 %v3549_v54  ;;  %2482 = vmatprep.subr.bf16.mxu0 %v3677_v55  ;;  %v3757_v53 = vcombine.high %v1010_v48, %v1014_v49  ;;  %v874_v56 = vld [vmem:[#allocation6 + $0x348] sm:$0xff]  ;;  %v3756_v54 = vcombine.low %v1010_v48, %v1014_v49  ;;  %v831_v48 = vld [vmem:[#allocation6 + $0x1f0] sm:$0xff] }
 0x203   :  { %v878_v57 = vld [vmem:[#allocation6 + $0x368] sm:$0xff]  ;;  %v955_v49 = vld [vmem:[#allocation6 + $0x5d0] sm:$0xff] }
 0x204   :  { %v1002_v60 = vld [vmem:[#allocation6 + $0x748] sm:$0xff]  ;;  %v3621_v55 = vcombine.high %v874_v56, %v878_v57 }
 0x205   :  { %2440 = vmatpush1.bf16.msra.mxu1 %v3548_v3  ;;  %2483 = vmatpush1.bf16.msra.mxu0 %v3676_v4  ;;  %v1006_v61 = vld [vmem:[#allocation6 + $0x768] sm:$0xff]  ;;  %v3620_v4 = vcombine.low %v874_v56, %v878_v57  ;;  %v819_v57 = vld [vmem:[#allocation6 + $0x190] sm:$0xff] }
 0x206   :  { %2441 = vmatprep.subr.bf16.mxu1 %v3541_v5  ;;  %2484 = vmatprep.subr.bf16.mxu0 %v3669_v6  ;;  %v3749_v63 = vcombine.high %v1002_v60, %v1006_v61  ;;  %v866_v0 = vld [vmem:[#allocation6 + $0x308] sm:$0xff]  ;;  %v3748_v5 = vcombine.low %v1002_v60, %v1006_v61  ;;  %v823_v60 = vld [vmem:[#allocation6 + $0x1b0] sm:$0xff] }
 0x207   :  { %v870_v1 = vld [vmem:[#allocation6 + $0x328] sm:$0xff]  ;;  %v947_v61 = vld [vmem:[#allocation6 + $0x590] sm:$0xff] }
 0x208   :  { %v994_v2 = vld [vmem:[#allocation6 + $0x708] sm:$0xff]  ;;  %v3613_v6 = vcombine.high %v866_v0, %v870_v1 }
 0x209   :  { %2442 = vmatpush1.bf16.msra.mxu1 %v3540_v11  ;;  %2485 = vmatpush1.bf16.msra.mxu0 %v3668_v12  ;;  %v998_v3 = vld [vmem:[#allocation6 + $0x728] sm:$0xff]  ;;  %v3612_v12 = vcombine.low %v866_v0, %v870_v1  ;;  %v811_v1 = vld [vmem:[#allocation6 + $0x150] sm:$0xff] }
 0x20a   :  { %2443 = vmatprep.subr.bf16.mxu1 %v3533_v13  ;;  %2486 = vmatprep.subr.bf16.mxu0 %v3661_v14  ;;  %v3741_v7 = vcombine.high %v994_v2, %v998_v3  ;;  %v858_v8 = vld [vmem:[#allocation6 + $0x2c8] sm:$0xff]  ;;  %v3740_v13 = vcombine.low %v994_v2, %v998_v3  ;;  %v815_v2 = vld [vmem:[#allocation6 + $0x170] sm:$0xff] }
 0x20b   :  { %v862_v9 = vld [vmem:[#allocation6 + $0x2e8] sm:$0xff]  ;;  %v939_v3 = vld [vmem:[#allocation6 + $0x550] sm:$0xff] }
 0x20c   :  { %v986_v10 = vld [vmem:[#allocation6 + $0x6c8] sm:$0xff]  ;;  %v3605_v14 = vcombine.high %v858_v8, %v862_v9 }
 0x20d   :  { %2444 = vmatpush1.bf16.msra.mxu1 %v3532_v19  ;;  %2487 = vmatpush1.bf16.msra.mxu0 %v3660_v20  ;;  %v990_v11 = vld [vmem:[#allocation6 + $0x6e8] sm:$0xff]  ;;  %v3604_v20 = vcombine.low %v858_v8, %v862_v9  ;;  %v803_v9 = vld [vmem:[#allocation6 + $0x110] sm:$0xff] }
 0x20e   :  { %2445 = vmatprep.subr.bf16.mxu1 %v3525_v21  ;;  %2488 = vmatprep.subr.bf16.mxu0 %v3653_v22  ;;  %v3733_v15 = vcombine.high %v986_v10, %v990_v11  ;;  %v850_v16 = vld [vmem:[#allocation6 + $0x288] sm:$0xff]  ;;  %v3732_v21 = vcombine.low %v986_v10, %v990_v11  ;;  %v807_v10 = vld [vmem:[#allocation6 + $0x130] sm:$0xff] }
 0x20f   :  { %v854_v17 = vld [vmem:[#allocation6 + $0x2a8] sm:$0xff]  ;;  %v931_v11 = vld [vmem:[#allocation6 + $0x510] sm:$0xff] }
 0x210   :  { %v978_v18 = vld [vmem:[#allocation6 + $0x688] sm:$0xff]  ;;  %v3597_v22 = vcombine.high %v850_v16, %v854_v17 }
 0x211   :  { %2446 = vmatpush1.bf16.msra.mxu1 %v3524_v30  ;;  %2489 = vmatpush1.bf16.msra.mxu0 %v3652_v31  ;;  %v982_v19 = vld [vmem:[#allocation6 + $0x6a8] sm:$0xff]  ;;  %v3596_v31 = vcombine.low %v850_v16, %v854_v17  ;;  %v795_v17 = vld [vmem:[#allocation6 + $0xd0] sm:$0xff] }
 0x212   :  { %2447 = vmatprep.subr.bf16.mxu1 %v3517_v32  ;;  %2490 = vmatprep.subr.bf16.mxu0 %v3645_v33  ;;  %v3725_v23 = vcombine.high %v978_v18, %v982_v19  ;;  %v842_v24 = vld [vmem:[#allocation6 + $0x248] sm:$0xff]  ;;  %v3724_v32 = vcombine.low %v978_v18, %v982_v19  ;;  %v799_v18 = vld [vmem:[#allocation6 + $0xf0] sm:$0xff] }
 0x213   :  { %v846_v25 = vld [vmem:[#allocation6 + $0x268] sm:$0xff]  ;;  %v923_v19 = vld [vmem:[#allocation6 + $0x4d0] sm:$0xff] }
 0x214   :  { %v970_v26 = vld [vmem:[#allocation6 + $0x648] sm:$0xff]  ;;  %v3589_v33 = vcombine.high %v842_v24, %v846_v25 }
 0x215   :  { %2448 = vmatpush1.bf16.msra.mxu1 %v3516_v38  ;;  %2491 = vmatpush1.bf16.msra.mxu0 %v3644_v43  ;;  %v974_v30 = vld [vmem:[#allocation6 + $0x668] sm:$0xff]  ;;  %v3588_v43 = vcombine.low %v842_v24, %v846_v25  ;;  %v787_v25 = vld [vmem:[#allocation6 + $0x90] sm:$0xff] }
 0x216   :  { %2449 = vmatprep.subr.bf16.mxu1 %v3637_v44  ;;  %2492 = vmatprep.subr.bf16.mxu0 %v3765_v45  ;;  %v3717_v34 = vcombine.high %v970_v26, %v974_v30  ;;  %v834_v35 = vld [vmem:[#allocation6 + $0x208] sm:$0xff]  ;;  %v3716_v44 = vcombine.low %v970_v26, %v974_v30  ;;  %v791_v26 = vld [vmem:[#allocation6 + $0xb0] sm:$0xff] }
 0x217   :  { %v838_v36 = vld [vmem:[#allocation6 + $0x228] sm:$0xff]  ;;  %v915_v30 = vld [vmem:[#allocation6 + $0x490] sm:$0xff] }
 0x218   :  { %v962_v37 = vld [vmem:[#allocation6 + $0x608] sm:$0xff]  ;;  %v3581_v45 = vcombine.high %v834_v35, %v838_v36 }
 0x219   :  { %2450 = vmatpush2.bf16.msra.mxu1 %v3636_v50  ;;  %2493 = vmatpush2.bf16.msra.mxu0 %v3764_v51  ;;  %v966_v38 = vld [vmem:[#allocation6 + $0x628] sm:$0xff]  ;;  %v959_v50 = vld [vmem:[#allocation6 + $0x5f0] sm:$0xff]  ;;  %v3580_v51 = vcombine.low %v834_v35, %v838_v36 }
 0x21a   :  { %2451 = vmatprep.subr.bf16.mxu1 %v3629_v52  ;;  %2494 = vmatprep.subr.bf16.mxu0 %v3757_v53  ;;  %v3709_v46 = vcombine.high %v962_v37, %v966_v38  ;;  %v3708_v52 = vcombine.low %v962_v37, %v966_v38  ;;  %v3575_v53 = vcombine.high %v827_v47, %v831_v48  ;;  %v779_v36 = vld [vmem:[#allocation6 + $0x50] sm:$0xff] }
 0x21b   :  { %v3703_v56 = vcombine.high %v955_v49, %v959_v50  ;;  %v783_v37 = vld [vmem:[#allocation6 + $0x70] sm:$0xff] }
 0x21c   :  { %v907_v38 = vld [vmem:[#allocation6 + $0x450] sm:$0xff] }
 0x21d   :  { %2452 = vmatpush2.bf16.msra.mxu1 %v3628_v62  ;;  %2495 = vmatpush2.bf16.msra.mxu0 %v3756_v54  ;;  %v951_v62 = vld [vmem:[#allocation6 + $0x5b0] sm:$0xff]  ;;  %v3574_v54 = vcombine.low %v827_v47, %v831_v48 }
 0x21e   :  { %2453 = vmatprep.subr.bf16.mxu1 %v3621_v55  ;;  %2496 = vmatprep.subr.bf16.mxu0 %v3749_v63  ;;  %v3702_v55 = vcombine.low %v955_v49, %v959_v50  ;;  %v3567_v63 = vcombine.high %v819_v57, %v823_v60  ;;  %v3695_v0 = vcombine.high %v947_v61, %v951_v62  ;;  %v771_v48 = vld [vmem:[#allocation6 + $0x10] sm:$0xff] }
 0x21f   :  { %v775_v49 = vld [vmem:[#allocation6 + $0x30] sm:$0xff] }
 0x220   :  { %v899_v50 = vld [vmem:[#allocation6 + $0x410] sm:$0xff] }
 0x221   :  { %2454 = vmatpush2.bf16.msra.mxu1 %v3620_v4  ;;  %2497 = vmatpush2.bf16.msra.mxu0 %v3748_v5  ;;  %v943_v4 = vld [vmem:[#allocation6 + $0x570] sm:$0xff]  ;;  %v3566_v5 = vcombine.low %v819_v57, %v823_v60 }
 0x222   :  { %2455 = vmatprep.subr.bf16.mxu1 %v3613_v6  ;;  %2498 = vmatprep.subr.bf16.mxu0 %v3741_v7  ;;  %v3694_v6 = vcombine.low %v947_v61, %v951_v62  ;;  %v3559_v7 = vcombine.high %v811_v1, %v815_v2  ;;  %v3687_v8 = vcombine.high %v939_v3, %v943_v4  ;;  %v891_v60 = vld [vmem:[#allocation6 + $0x3d0] sm:$0xff] }
 0x223   :  { %v895_v61 = vld [vmem:[#allocation6 + $0x3f0] sm:$0xff] }
 0x224   :  { %v1019_v62 = vld [vmem:[#allocation6 + $0x7d0] sm:$0xff] }
 0x225   :  { %2456 = vmatpush2.bf16.msra.mxu1 %v3612_v12  ;;  %2499 = vmatpush2.bf16.msra.mxu0 %v3740_v13  ;;  %v935_v12 = vld [vmem:[#allocation6 + $0x530] sm:$0xff]  ;;  %v3558_v13 = vcombine.low %v811_v1, %v815_v2 }
 0x226   :  { %2457 = vmatprep.subr.bf16.mxu1 %v3605_v14  ;;  %2500 = vmatprep.subr.bf16.mxu0 %v3733_v15  ;;  %v3686_v14 = vcombine.low %v939_v3, %v943_v4  ;;  %v3551_v15 = vcombine.high %v803_v9, %v807_v10  ;;  %v3679_v16 = vcombine.high %v931_v11, %v935_v12  ;;  %v883_v2 = vld [vmem:[#allocation6 + $0x390] sm:$0xff] }
 0x227   :  { %v887_v3 = vld [vmem:[#allocation6 + $0x3b0] sm:$0xff] }
 0x228   :  { %v1011_v4 = vld [vmem:[#allocation6 + $0x790] sm:$0xff] }
 0x229   :  { %2458 = vmatpush2.bf16.msra.mxu1 %v3604_v20  ;;  %2501 = vmatpush2.bf16.msra.mxu0 %v3732_v21  ;;  %v927_v20 = vld [vmem:[#allocation6 + $0x4f0] sm:$0xff]  ;;  %v3550_v21 = vcombine.low %v803_v9, %v807_v10 }
 0x22a   :  { %2459 = vmatprep.subr.bf16.mxu1 %v3597_v22  ;;  %2502 = vmatprep.subr.bf16.mxu0 %v3725_v23  ;;  %v3678_v22 = vcombine.low %v931_v11, %v935_v12  ;;  %v3543_v23 = vcombine.high %v795_v17, %v799_v18  ;;  %v3671_v24 = vcombine.high %v923_v19, %v927_v20  ;;  %v875_v10 = vld [vmem:[#allocation6 + $0x350] sm:$0xff] }
 0x22b   :  { %v879_v11 = vld [vmem:[#allocation6 + $0x370] sm:$0xff] }
 0x22c   :  { %v1003_v12 = vld [vmem:[#allocation6 + $0x750] sm:$0xff] }
 0x22d   :  { %2460 = vmatpush2.bf16.msra.mxu1 %v3596_v31  ;;  %2503 = vmatpush2.bf16.msra.mxu0 %v3724_v32  ;;  %v919_v31 = vld [vmem:[#allocation6 + $0x4b0] sm:$0xff]  ;;  %v3542_v32 = vcombine.low %v795_v17, %v799_v18 }
 0x22e   :  { %2461 = vmatprep.subr.bf16.mxu1 %v3589_v33  ;;  %2504 = vmatprep.subr.bf16.mxu0 %v3717_v34  ;;  %v3670_v33 = vcombine.low %v923_v19, %v927_v20  ;;  %v3535_v34 = vcombine.high %v787_v25, %v791_v26  ;;  %v3663_v35 = vcombine.high %v915_v30, %v919_v31  ;;  %v867_v18 = vld [vmem:[#allocation6 + $0x310] sm:$0xff] }
 0x22f   :  { %v871_v19 = vld [vmem:[#allocation6 + $0x330] sm:$0xff] }
 0x230   :  { %v995_v20 = vld [vmem:[#allocation6 + $0x710] sm:$0xff] }
 0x231   :  { %2462 = vmatpush2.bf16.msra.mxu1 %v3588_v43  ;;  %2505 = vmatpush2.bf16.msra.mxu0 %v3716_v44  ;;  %v911_v43 = vld [vmem:[#allocation6 + $0x470] sm:$0xff]  ;;  %v3534_v44 = vcombine.low %v787_v25, %v791_v26 }
 0x232   :  { %2463 = vmatprep.subr.bf16.mxu1 %v3581_v45  ;;  %2506 = vmatprep.subr.bf16.mxu0 %v3709_v46  ;;  %v3662_v45 = vcombine.low %v915_v30, %v919_v31  ;;  %v3527_v46 = vcombine.high %v779_v36, %v783_v37  ;;  %v3655_v47 = vcombine.high %v907_v38, %v911_v43  ;;  %v859_v26 = vld [vmem:[#allocation6 + $0x2d0] sm:$0xff] }
 0x233   :  { %v863_v30 = vld [vmem:[#allocation6 + $0x2f0] sm:$0xff] }
 0x234   :  { %v987_v31 = vld [vmem:[#allocation6 + $0x6d0] sm:$0xff] }
 0x235   :  { %2464 = vmatpush2.bf16.msra.mxu1 %v3580_v51  ;;  %2507 = vmatpush2.bf16.msra.mxu0 %v3708_v52  ;;  %v903_v51 = vld [vmem:[#allocation6 + $0x430] sm:$0xff]  ;;  %v3526_v52 = vcombine.low %v779_v36, %v783_v37 }
 0x236   :  { %2519 = vmatprep.subr.bf16.mxu1 %v3575_v53  ;;  %2562 = vmatprep.subr.bf16.mxu0 %v3703_v56  ;;  %v3654_v53 = vcombine.low %v907_v38, %v911_v43  ;;  %v3519_v56 = vcombine.high %v771_v48, %v775_v49  ;;  %v3647_v57 = vcombine.high %v899_v50, %v903_v51  ;;  %v851_v37 = vld [vmem:[#allocation6 + $0x290] sm:$0xff] }
 0x237   :  { %v855_v38 = vld [vmem:[#allocation6 + $0x2b0] sm:$0xff] }
 0x238   :  { %2466 = vmatmul.mubr.bf16.vlgmr.msra.gmra.mxu1 %v4342_v41  ;;  %2509 = vmatmul.mubr.bf16.vlgmr.msra.gmra.mxu0 %v4344_v42  ;;  %v979_v43 = vld [vmem:[#allocation6 + $0x690] sm:$0xff] }
 0x239   :  { %2520 = vmatpush1.bf16.msra.mxu1 %v3574_v54  ;;  %2551 = vmatprep.mubr.bf16.mxu1 %v4338_v39  ;;  %v1023_v54 = vld [vmem:[#allocation6 + $0x7f0] sm:$0xff] }
 0x23a   :  { %2563 = vmatpush1.bf16.msra.mxu0 %v3702_v55  ;;  %2594 = vmatprep.mubr.bf16.mxu0 %v4340_v40  ;;  %v3518_v55 = vcombine.low %v771_v48, %v775_v49  ;;  %v3767_v1 = vcombine.high %v1019_v62, %v1023_v54  ;;  %v843_v49 = vld [vmem:[#allocation6 + $0x250] sm:$0xff] }
 0x23b   :  { %2521 = vmatprep.subr.bf16.mxu1 %v3567_v63  ;;  %2564 = vmatprep.subr.bf16.mxu0 %v3695_v0  ;;  %v3646_v63 = vcombine.low %v899_v50, %v903_v51  ;;  %v3639_v0 = vcombine.high %v891_v60, %v895_v61  ;;  %v847_v50 = vld [vmem:[#allocation6 + $0x270] sm:$0xff] }
 0x23c   :  { %v971_v51 = vld [vmem:[#allocation6 + $0x650] sm:$0xff] }
 0x23d   :  { %2522 = vmatpush1.bf16.msra.mxu1 %v3566_v5  ;;  %v1015_v5 = vld [vmem:[#allocation6 + $0x7b0] sm:$0xff] }
 0x23e   :  { %2565 = vmatpush1.bf16.msra.mxu0 %v3694_v6  ;;  %2523 = vmatprep.subr.bf16.mxu1 %v3559_v7  ;;  %v3638_v6 = vcombine.low %v891_v60, %v895_v61  ;;  %v3766_v7 = vcombine.low %v1019_v62, %v1023_v54  ;;  %v3759_v9 = vcombine.high %v1011_v4, %v1015_v5  ;;  %v835_v61 = vld [vmem:[#allocation6 + $0x210] sm:$0xff] }
 0x23f   :  { %2566 = vmatprep.subr.bf16.mxu0 %v3687_v8  ;;  %v3631_v8 = vcombine.high %v883_v2, %v887_v3  ;;  %v839_v62 = vld [vmem:[#allocation6 + $0x230] sm:$0xff] }
 0x240   :  { %v963_v54 = vld [vmem:[#allocation6 + $0x610] sm:$0xff] }
 0x241   :  { %2524 = vmatpush1.bf16.msra.mxu1 %v3558_v13  ;;  %v1007_v13 = vld [vmem:[#allocation6 + $0x770] sm:$0xff] }
 0x242   :  { %2567 = vmatpush1.bf16.msra.mxu0 %v3686_v14  ;;  %2525 = vmatprep.subr.bf16.mxu1 %v3551_v15  ;;  %v3630_v14 = vcombine.low %v883_v2, %v887_v3  ;;  %v3758_v15 = vcombine.low %v1011_v4, %v1015_v5  ;;  %v3751_v17 = vcombine.high %v1003_v12, %v1007_v13  ;;  %v828_v3 = vld [vmem:[#allocation6 + $0x1d8] sm:$0xff] }
 0x243   :  { %2568 = vmatprep.subr.bf16.mxu0 %v3679_v16  ;;  %v3623_v16 = vcombine.high %v875_v10, %v879_v11  ;;  %v832_v4 = vld [vmem:[#allocation6 + $0x1f8] sm:$0xff] }
 0x244   :  { %v956_v5 = vld [vmem:[#allocation6 + $0x5d8] sm:$0xff] }
 0x245   :  { %2526 = vmatpush1.bf16.msra.mxu1 %v3550_v21  ;;  %v999_v21 = vld [vmem:[#allocation6 + $0x730] sm:$0xff] }
 0x246   :  { %2569 = vmatpush1.bf16.msra.mxu0 %v3678_v22  ;;  %2527 = vmatprep.subr.bf16.mxu1 %v3543_v23  ;;  %v3622_v22 = vcombine.low %v875_v10, %v879_v11  ;;  %v3750_v23 = vcombine.low %v1003_v12, %v1007_v13  ;;  %v3743_v25 = vcombine.high %v995_v20, %v999_v21  ;;  %v820_v11 = vld [vmem:[#allocation6 + $0x198] sm:$0xff] }
 0x247   :  { %2570 = vmatprep.subr.bf16.mxu0 %v3671_v24  ;;  %v3615_v24 = vcombine.high %v867_v18, %v871_v19  ;;  %v824_v12 = vld [vmem:[#allocation6 + $0x1b8] sm:$0xff]  ;;  %v3576_v13 = vcombine.low %v828_v3, %v832_v4 }
 0x249   :  { %2528 = vmatpush1.bf16.msra.mxu1 %v3542_v32  ;;  %v991_v32 = vld [vmem:[#allocation6 + $0x6f0] sm:$0xff] }
 0x24a   :  { %2571 = vmatpush1.bf16.msra.mxu0 %v3670_v33  ;;  %2529 = vmatprep.subr.bf16.mxu1 %v3535_v34  ;;  %v3614_v33 = vcombine.low %v867_v18, %v871_v19  ;;  %v3742_v34 = vcombine.low %v995_v20, %v999_v21  ;;  %v3735_v36 = vcombine.high %v987_v31, %v991_v32  ;;  %v812_v18 = vld [vmem:[#allocation6 + $0x158] sm:$0xff] }
 0x24b   :  { %2572 = vmatprep.subr.bf16.mxu0 %v3663_v35  ;;  %v3607_v35 = vcombine.high %v859_v26, %v863_v30  ;;  %v816_v19 = vld [vmem:[#allocation6 + $0x178] sm:$0xff] }
 0x24c   :  { %v940_v21 = vld [vmem:[#allocation6 + $0x558] sm:$0xff] }
 0x24d   :  { %2530 = vmatpush1.bf16.msra.mxu1 %v3534_v44  ;;  %v983_v44 = vld [vmem:[#allocation6 + $0x6b0] sm:$0xff] }
 0x24e   :  { %2573 = vmatpush1.bf16.msra.mxu0 %v3662_v45  ;;  %2531 = vmatprep.subr.bf16.mxu1 %v3527_v46  ;;  %v3606_v45 = vcombine.low %v859_v26, %v863_v30  ;;  %v3734_v46 = vcombine.low %v987_v31, %v991_v32  ;;  %v3727_v48 = vcombine.high %v979_v43, %v983_v44  ;;  %v804_v30 = vld [vmem:[#allocation6 + $0x118] sm:$0xff] }
 0x24f   :  { %2574 = vmatprep.subr.bf16.mxu0 %v3655_v47  ;;  %v3599_v47 = vcombine.high %v851_v37, %v855_v38  ;;  %v808_v31 = vld [vmem:[#allocation6 + $0x138] sm:$0xff] }
 0x250   :  { %v932_v32 = vld [vmem:[#allocation6 + $0x518] sm:$0xff] }
 0x251   :  { %2532 = vmatpush1.bf16.msra.mxu1 %v3526_v52  ;;  %v975_v52 = vld [vmem:[#allocation6 + $0x670] sm:$0xff] }
 0x252   :  { %2575 = vmatpush1.bf16.msra.mxu0 %v3654_v53  ;;  %2533 = vmatprep.subr.bf16.mxu1 %v3519_v56  ;;  %v3598_v53 = vcombine.low %v851_v37, %v855_v38  ;;  %v3726_v56 = vcombine.low %v979_v43, %v983_v44  ;;  %v3719_v60 = vcombine.high %v971_v51, %v975_v52  ;;  %v796_v37 = vld [vmem:[#allocation6 + $0xd8] sm:$0xff] }
 0x253   :  { %2576 = vmatprep.subr.bf16.mxu0 %v3647_v57  ;;  %v3591_v57 = vcombine.high %v843_v49, %v847_v50  ;;  %v800_v38 = vld [vmem:[#allocation6 + $0xf8] sm:$0xff] }
 0x254   :  { %v924_v43 = vld [vmem:[#allocation6 + $0x4d8] sm:$0xff] }
 0x255   :  { %2534 = vmatpush1.bf16.msra.mxu1 %v3518_v55  ;;  %v967_v55 = vld [vmem:[#allocation6 + $0x630] sm:$0xff]  ;;  %v928_v44 = vld [vmem:[#allocation6 + $0x4f8] sm:$0xff] }
 0x256   :  { %2577 = vmatpush1.bf16.msra.mxu0 %v3646_v63  ;;  %2535 = vmatprep.subr.bf16.mxu1 %v3639_v0  ;;  %v3590_v63 = vcombine.low %v843_v49, %v847_v50  ;;  %v3718_v0 = vcombine.low %v971_v51, %v975_v52  ;;  %v3711_v2 = vcombine.high %v963_v54, %v967_v55  ;;  %v792_v49 = vld [vmem:[#allocation6 + $0xb8] sm:$0xff] }
 0x257   :  { %2578 = vmatprep.subr.bf16.mxu0 %v3767_v1  ;;  %v3583_v1 = vcombine.high %v835_v61, %v839_v62  ;;  %v916_v50 = vld [vmem:[#allocation6 + $0x498] sm:$0xff]  ;;  %v3544_v52 = vcombine.low %v796_v37, %v800_v38 }
 0x258   :  { %v920_v51 = vld [vmem:[#allocation6 + $0x4b8] sm:$0xff] }
 0x259   :  { %2536 = vmatpush2.bf16.msra.mxu1 %v3638_v6  ;;  %v960_v6 = vld [vmem:[#allocation6 + $0x5f8] sm:$0xff] }
 0x25a   :  { %2579 = vmatpush2.bf16.msra.mxu0 %v3766_v7  ;;  %2537 = vmatprep.subr.bf16.mxu1 %v3631_v8  ;;  %v3582_v7 = vcombine.low %v835_v61, %v839_v62  ;;  %v3710_v8 = vcombine.low %v963_v54, %v967_v55  ;;  %v3705_v10 = vcombine.high %v956_v5, %v960_v6  ;;  %v784_v61 = vld [vmem:[#allocation6 + $0x78] sm:$0xff] }
 0x25b   :  { %2580 = vmatprep.subr.bf16.mxu0 %v3759_v9  ;;  %v3577_v9 = vcombine.high %v828_v3, %v832_v4  ;;  %v908_v62 = vld [vmem:[#allocation6 + $0x458] sm:$0xff] }
 0x25c   :  { %v912_v54 = vld [vmem:[#allocation6 + $0x478] sm:$0xff] }
 0x25d   :  { %2538 = vmatpush2.bf16.msra.mxu1 %v3630_v14  ;;  %v948_v14 = vld [vmem:[#allocation6 + $0x598] sm:$0xff] }
 0x25e   :  { %2581 = vmatpush2.bf16.msra.mxu0 %v3758_v15  ;;  %2539 = vmatprep.subr.bf16.mxu1 %v3623_v16  ;;  %v952_v15 = vld [vmem:[#allocation6 + $0x5b8] sm:$0xff]  ;;  %v3704_v16 = vcombine.low %v956_v5, %v960_v6 }
 0x25f   :  { %2582 = vmatprep.subr.bf16.mxu0 %v3751_v17  ;;  %v3569_v17 = vcombine.high %v820_v11, %v824_v12  ;;  %v3697_v20 = vcombine.high %v948_v14, %v952_v15  ;;  %v776_v3 = vld [vmem:[#allocation6 + $0x38] sm:$0xff] }
 0x260   :  { %v900_v4 = vld [vmem:[#allocation6 + $0x418] sm:$0xff] }
 0x261   :  { %2540 = vmatpush2.bf16.msra.mxu1 %v3622_v22  ;;  %v944_v22 = vld [vmem:[#allocation6 + $0x578] sm:$0xff] }
 0x262   :  { %2583 = vmatpush2.bf16.msra.mxu0 %v3750_v23  ;;  %2541 = vmatprep.subr.bf16.mxu1 %v3615_v24  ;;  %v3568_v23 = vcombine.low %v820_v11, %v824_v12  ;;  %v3696_v24 = vcombine.low %v948_v14, %v952_v15  ;;  %v3689_v26 = vcombine.high %v940_v21, %v944_v22  ;;  %v904_v5 = vld [vmem:[#allocation6 + $0x438] sm:$0xff] }
 0x263   :  { %2584 = vmatprep.subr.bf16.mxu0 %v3743_v25  ;;  %v3561_v25 = vcombine.high %v812_v18, %v816_v19  ;;  %v896_v11 = vld [vmem:[#allocation6 + $0x3f8] sm:$0xff]  ;;  %v3648_v15 = vcombine.low %v900_v4, %v904_v5 }
 0x264   :  { %v1020_v12 = vld [vmem:[#allocation6 + $0x7d8] sm:$0xff] }
 0x265   :  { %2542 = vmatpush2.bf16.msra.mxu1 %v3614_v33  ;;  %v936_v33 = vld [vmem:[#allocation6 + $0x538] sm:$0xff] }
 0x266   :  { %2585 = vmatpush2.bf16.msra.mxu0 %v3742_v34  ;;  %2543 = vmatprep.subr.bf16.mxu1 %v3607_v35  ;;  %v3560_v34 = vcombine.low %v812_v18, %v816_v19  ;;  %v3688_v35 = vcombine.low %v940_v21, %v944_v22  ;;  %v884_v18 = vld [vmem:[#allocation6 + $0x398] sm:$0xff] }
 0x267   :  { %2586 = vmatprep.subr.bf16.mxu0 %v3735_v36  ;;  %v3553_v36 = vcombine.high %v804_v30, %v808_v31  ;;  %v888_v19 = vld [vmem:[#allocation6 + $0x3b8] sm:$0xff] }
 0x268   :  { %v1016_v21 = vld [vmem:[#allocation6 + $0x7b8] sm:$0xff] }
 0x269   :  { %2544 = vmatpush2.bf16.msra.mxu1 %v3606_v45  ;;  %v3680_v45 = vcombine.low %v932_v32, %v936_v33 }
 0x26a   :  { %2587 = vmatpush2.bf16.msra.mxu0 %v3734_v46  ;;  %2545 = vmatprep.subr.bf16.mxu1 %v3599_v47  ;;  %v3545_v46 = vcombine.high %v796_v37, %v800_v38  ;;  %v3673_v47 = vcombine.high %v924_v43, %v928_v44  ;;  %v872_v37 = vld [vmem:[#allocation6 + $0x338] sm:$0xff] }
 0x26b   :  { %2588 = vmatprep.subr.bf16.mxu0 %v3727_v48  ;;  %v788_v48 = vld [vmem:[#allocation6 + $0x98] sm:$0xff] }
 0x26c   :  { %v3536_v55 = vcombine.low %v788_v48, %v792_v49  ;;  %v996_v38 = vld [vmem:[#allocation6 + $0x718] sm:$0xff] }
 0x26d   :  { %2546 = vmatpush2.bf16.msra.mxu1 %v3598_v53  ;;  %v3672_v53 = vcombine.low %v924_v43, %v928_v44  ;;  %v1000_v43 = vld [vmem:[#allocation6 + $0x738] sm:$0xff] }
 0x26e   :  { %2589 = vmatpush2.bf16.msra.mxu0 %v3726_v56  ;;  %2547 = vmatprep.subr.bf16.mxu1 %v3591_v57  ;;  %v3537_v56 = vcombine.high %v788_v48, %v792_v49  ;;  %v3665_v57 = vcombine.high %v916_v50, %v920_v51  ;;  %v864_v48 = vld [vmem:[#allocation6 + $0x2f8] sm:$0xff] }
 0x26f   :  { %2590 = vmatprep.subr.bf16.mxu0 %v3719_v60  ;;  %v780_v60 = vld [vmem:[#allocation6 + $0x58] sm:$0xff] }
 0x270   :  { %v3528_v6 = vcombine.low %v780_v60, %v784_v61  ;;  %v988_v49 = vld [vmem:[#allocation6 + $0x6d8] sm:$0xff] }
 0x271   :  { %2548 = vmatpush2.bf16.msra.mxu1 %v3590_v63  ;;  %v3664_v63 = vcombine.low %v916_v50, %v920_v51  ;;  %v992_v50 = vld [vmem:[#allocation6 + $0x6f8] sm:$0xff] }
 0x272   :  { %2591 = vmatpush2.bf16.msra.mxu0 %v3718_v0  ;;  %2549 = vmatprep.subr.bf16.mxu1 %v3583_v1  ;;  %v3529_v0 = vcombine.high %v780_v60, %v784_v61  ;;  %v3657_v1 = vcombine.high %v908_v62, %v912_v54  ;;  %v856_v60 = vld [vmem:[#allocation6 + $0x2b8] sm:$0xff] }
 0x273   :  { %2592 = vmatprep.subr.bf16.mxu0 %v3711_v2  ;;  %v772_v2 = vld [vmem:[#allocation6 + $0x18] sm:$0xff] }
 0x274   :  { %v3520_v14 = vcombine.low %v772_v2, %v776_v3  ;;  %v980_v61 = vld [vmem:[#allocation6 + $0x698] sm:$0xff] }
 0x275   :  { %2550 = vmatpush2.bf16.msra.mxu1 %v3582_v7  ;;  %v3656_v7 = vcombine.low %v908_v62, %v912_v54  ;;  %v984_v62 = vld [vmem:[#allocation6 + $0x6b8] sm:$0xff] }
 0x276   :  { %2593 = vmatpush2.bf16.msra.mxu0 %v3710_v8  ;;  %2605 = vmatprep.subr.bf16.mxu1 %v3577_v9  ;;  %v3521_v8 = vcombine.high %v772_v2, %v776_v3  ;;  %v3649_v9 = vcombine.high %v900_v4, %v904_v5  ;;  %v848_v2 = vld [vmem:[#allocation6 + $0x278] sm:$0xff] }
 0x277   :  { %2648 = vmatprep.subr.bf16.mxu0 %v3705_v10  ;;  %v892_v10 = vld [vmem:[#allocation6 + $0x3d8] sm:$0xff] }
 0x278   :  { %2552 = vmatmul.mubr.bf16.vlgmr.msra.gmra.mxu1 %v4342_v41  ;;  %v3640_v22 = vcombine.low %v892_v10, %v896_v11  ;;  %v972_v3 = vld [vmem:[#allocation6 + $0x658] sm:$0xff] }
 0x279   :  { %2595 = vmatmul.mubr.bf16.vlgmr.msra.gmra.mxu0 %v4344_v42  ;;  %2606 = vmatpush1.bf16.msra.mxu1 %v3576_v13  ;;  %v1024_v13 = vld [vmem:[#allocation6 + $0x7f8] sm:$0xff] }
 0x27a   :  { %2637 = vmatprep.mubr.bf16.mxu1 %v4338_v39  ;;  %2649 = vmatpush1.bf16.msra.mxu0 %v3704_v16  ;;  %v3681_v39 = vcombine.high %v932_v32, %v936_v33  ;;  %v3641_v16 = vcombine.high %v892_v10, %v896_v11  ;;  %v1008_v32 = vld [vmem:[#allocation6 + $0x778] sm:$0xff]  ;;  %v3632_v33 = vcombine.low %v884_v18, %v888_v19 }
 0x27b   :  { %2680 = vmatprep.mubr.bf16.mxu0 %v4340_v40  ;;  %2607 = vmatprep.subr.bf16.mxu1 %v3569_v17  ;;  %v3552_v40 = vcombine.low %v804_v30, %v808_v31  ;;  %v3769_v17 = vcombine.high %v1020_v12, %v1024_v13  ;;  %v880_v30 = vld [vmem:[#allocation6 + $0x378] sm:$0xff] }
 0x27c   :  { %2650 = vmatprep.subr.bf16.mxu0 %v3697_v20  ;;  %v1012_v20 = vld [vmem:[#allocation6 + $0x798] sm:$0xff] }
 0x27d   :  { %2608 = vmatpush1.bf16.msra.mxu1 %v3568_v23  ;;  %v3768_v23 = vcombine.low %v1020_v12, %v1024_v13  ;;  %v1004_v31 = vld [vmem:[#allocation6 + $0x758] sm:$0xff] }
 0x27e   :  { %2651 = vmatpush1.bf16.msra.mxu0 %v3696_v24  ;;  %2609 = vmatprep.subr.bf16.mxu1 %v3561_v25  ;;  %v3633_v24 = vcombine.high %v884_v18, %v888_v19  ;;  %v3761_v25 = vcombine.high %v1012_v20, %v1016_v21  ;;  %v976_v4 = vld [vmem:[#allocation6 + $0x678] sm:$0xff] }
 0x27f   :  { %2652 = vmatprep.subr.bf16.mxu0 %v3689_v26  ;;  %v876_v26 = vld [vmem:[#allocation6 + $0x358] sm:$0xff] }
 0x280   :  { %v3624_v44 = vcombine.low %v876_v26, %v880_v30  ;;  %v840_v10 = vld [vmem:[#allocation6 + $0x238] sm:$0xff] }
 0x281   :  { %2610 = vmatpush1.bf16.msra.mxu1 %v3560_v34  ;;  %v3760_v34 = vcombine.low %v1012_v20, %v1016_v21  ;;  %v964_v11 = vld [vmem:[#allocation6 + $0x618] sm:$0xff] }
 0x282   :  { %2653 = vmatpush1.bf16.msra.mxu0 %v3688_v35  ;;  %2611 = vmatprep.subr.bf16.mxu1 %v3553_v36  ;;  %v3625_v35 = vcombine.high %v876_v26, %v880_v30  ;;  %v3753_v36 = vcombine.high %v1004_v31, %v1008_v32  ;;  %v968_v12 = vld [vmem:[#allocation6 + $0x638] sm:$0xff]  ;;  %v4084_v26 = vld [vmem:[#allocation7 + $0xf0] sm:$0xff]  }
 0x283   :  { %2654 = vmatprep.subr.bf16.mxu0 %v3681_v39  ;;  %v868_v39 = vld [vmem:[#allocation6 + $0x318] sm:$0xff]  ;;  %v3712_v18 = vcombine.low %v964_v11, %v968_v12 }
 0x284   :  { %v3616_v51 = vcombine.low %v868_v39, %v872_v37  ;;  %v4066_v19 = vld [vmem:[#allocation7 + $0x78] sm:$0xff]  }
 0x285   :  { %2612 = vmatpush1.bf16.msra.mxu1 %v3552_v40  ;;  %v3752_v40 = vcombine.low %v1004_v31, %v1008_v32  ;;  %v4082_v20 = vld [vmem:[#allocation7 + $0xf8] sm:$0xff]   ;;  %v4069_v32 = vld [vmem:[#allocation7 + $0x30] sm:$0xff]  }
 0x286   :  { %2655 = vmatpush1.bf16.msra.mxu0 %v3680_v45  ;;  %2613 = vmatprep.subr.bf16.mxu1 %v3545_v46  ;;  %v3617_v45 = vcombine.high %v868_v39, %v872_v37  ;;  %v3745_v46 = vcombine.high %v996_v38, %v1000_v43  ;;  %v4067_v21 = vld [vmem:[#allocation7 + $0x38] sm:$0xff]   ;;  %v4086_v37 = vld [vmem:[#allocation7 + $0xe8] sm:$0xff]  }
 0x287   :  { %2656 = vmatprep.subr.bf16.mxu0 %v3673_v47  ;;  %v860_v47 = vld [vmem:[#allocation6 + $0x2d8] sm:$0xff] }
 0x288   :  { %v3608_v54 = vcombine.low %v860_v47, %v864_v48 }
 0x289   :  { %2614 = vmatpush1.bf16.msra.mxu1 %v3544_v52  ;;  %v3744_v52 = vcombine.low %v996_v38, %v1000_v43 }
 0x28a   :  { %2657 = vmatpush1.bf16.msra.mxu0 %v3672_v53  ;;  %2615 = vmatprep.subr.bf16.mxu1 %v3537_v56  ;;  %v3609_v53 = vcombine.high %v860_v47, %v864_v48  ;;  %v3737_v56 = vcombine.high %v988_v49, %v992_v50 }
 0x28b   :  { %2658 = vmatprep.subr.bf16.mxu0 %v3665_v57  ;;  %v852_v57 = vld [vmem:[#allocation6 + $0x298] sm:$0xff] }
 0x28c   :  { %v3600_v5 = vcombine.low %v852_v57, %v856_v60 }
 0x28d   :  { %2616 = vmatpush1.bf16.msra.mxu1 %v3536_v55  ;;  %v3736_v55 = vcombine.low %v988_v49, %v992_v50  ;;  %v4073_v50 = vld [vmem:[#allocation7 + $0x20] sm:$0xff]  }
 0x28e   :  { %2659 = vmatpush1.bf16.msra.mxu0 %v3664_v63  ;;  %2617 = vmatprep.subr.bf16.mxu1 %v3529_v0  ;;  %v3601_v63 = vcombine.high %v852_v57, %v856_v60  ;;  %v3729_v0 = vcombine.high %v980_v61, %v984_v62 }
 0x28f   :  { %2660 = vmatprep.subr.bf16.mxu0 %v3657_v1  ;;  %v844_v1 = vld [vmem:[#allocation6 + $0x258] sm:$0xff] }
 0x290   :  { %v3592_v13 = vcombine.low %v844_v1, %v848_v2 }
 0x291   :  { %2618 = vmatpush1.bf16.msra.mxu1 %v3528_v6  ;;  %v3728_v6 = vcombine.low %v980_v61, %v984_v62  ;;  %v4075_v62 = vld [vmem:[#allocation7 + $0x18] sm:$0xff]  }
 0x292   :  { %2661 = vmatpush1.bf16.msra.mxu0 %v3656_v7  ;;  %2619 = vmatprep.subr.bf16.mxu1 %v3521_v8  ;;  %v3593_v7 = vcombine.high %v844_v1, %v848_v2  ;;  %v3721_v8 = vcombine.high %v972_v3, %v976_v4  ;;  %v4092_v1 = vld [vmem:[#allocation7 + $0xd0] sm:$0xff]  }
 0x293   :  { %2662 = vmatprep.subr.bf16.mxu0 %v3649_v9  ;;  %v836_v9 = vld [vmem:[#allocation6 + $0x218] sm:$0xff] }
 0x295   :  { %2620 = vmatpush1.bf16.msra.mxu1 %v3520_v14  ;;  %v3720_v14 = vcombine.low %v972_v3, %v976_v4  ;;  %v4077_v3 = vld [vmem:[#allocation7 + $0x10] sm:$0xff]  }
 0x296   :  { %2663 = vmatpush1.bf16.msra.mxu0 %v3648_v15  ;;  %2621 = vmatprep.subr.bf16.mxu1 %v3641_v16  ;;  %v3585_v15 = vcombine.high %v836_v9, %v840_v10  ;;  %v3713_v16 = vcombine.high %v964_v11, %v968_v12  ;;  %v4095_v11 = vld [vmem:[#allocation7 + $0x88] sm:$0xff]   ;;  %v4096_v12 = vld [vmem:[#allocation7 + $0xc0] sm:$0xff]  }
 0x297   :  { %2664 = vmatprep.subr.bf16.mxu0 %v3769_v17  ;;  %v3584_v17 = vcombine.low %v836_v9, %v840_v10  ;;  %v4080_v10 = vld [vmem:[#allocation7 + $0x40] sm:$0xff]  }
 0x299   :  { %2622 = vmatpush2.bf16.msra.mxu1 %v3640_v22  ;;  %v4363_v22 = vld [vmem:[%s4397_s6] sm:$0xff] }
 0x29a   :  { %2665 = vmatpush2.bf16.msra.mxu0 %v3768_v23  ;;  %2623 = vmatprep.subr.bf16.mxu1 %v3633_v24  ;;  %v4068_v23 = vld [vmem:[#allocation7 + $0x70] sm:$0xff]   ;;  %v4083_v24 = vld [vmem:[#allocation7 + $0xb8] sm:$0xff]   ;;  %v1030_v57 = vrot.slane %v4363_v22, %v4304_v29 }
 0x29b   :  { %2666 = vmatprep.subr.bf16.mxu0 %v3761_v25  ;;  %v1034_v25 = vrot.slane %v4363_v22, %v4301_v28  ;;  %v4093_v29 = vld [vmem:[#allocation7 + $0x90] sm:$0xff]  }
 0x29d   :  { %2624 = vmatpush2.bf16.msra.mxu1 %v3632_v33 }
 0x29e   :  { %2667 = vmatpush2.bf16.msra.mxu0 %v3760_v34  ;;  %2625 = vmatprep.subr.bf16.mxu1 %v3625_v35  ;;  %v4070_v35 = vld [vmem:[#allocation7 + $0x68] sm:$0xff]  }
 0x29f   :  { %2668 = vmatprep.subr.bf16.mxu0 %v3753_v36  ;;  %v4085_v36 = vld [vmem:[#allocation7 + $0xb0] sm:$0xff]  }
 0x2a1   :  { %2626 = vmatpush2.bf16.msra.mxu1 %v3624_v44 }
 0x2a2   :  { %2669 = vmatpush2.bf16.msra.mxu0 %v3752_v40  ;;  %2627 = vmatprep.subr.bf16.mxu1 %v3617_v45  ;;  %v4072_v40 = vld [vmem:[#allocation7 + $0x60] sm:$0xff]  }
 0x2a3   :  { %2670 = vmatprep.subr.bf16.mxu0 %v3745_v46  ;;  %v4088_v46 = vld [vmem:[#allocation7 + $0xe0] sm:$0xff]  }
 0x2a5   :  { %2628 = vmatpush2.bf16.msra.mxu1 %v3616_v51  ;;  %v4074_v51 = vld [vmem:[#allocation7 + $0x58] sm:$0xff]  }
 0x2a6   :  { %2671 = vmatpush2.bf16.msra.mxu0 %v3744_v52  ;;  %2629 = vmatprep.subr.bf16.mxu1 %v3609_v53  ;;  %v4089_v52 = vld [vmem:[#allocation7 + $0xa0] sm:$0xff]  }
 0x2a7   :  { %2672 = vmatprep.subr.bf16.mxu0 %v3737_v56  ;;  %v4090_v56 = vld [vmem:[#allocation7 + $0xd8] sm:$0xff]  }
 0x2a9   :  { %2630 = vmatpush2.bf16.msra.mxu1 %v3608_v54 }
 0x2aa   :  { %2673 = vmatpush2.bf16.msra.mxu0 %v3736_v55  ;;  %2631 = vmatprep.subr.bf16.mxu1 %v3601_v63  ;;  %v4076_v55 = vld [vmem:[#allocation7 + $0x50] sm:$0xff]   ;;  %v4091_v63 = vld [vmem:[#allocation7 + $0x98] sm:$0xff]  }
 0x2ab   :  { %2674 = vmatprep.subr.bf16.mxu0 %v3729_v0 }
 0x2ad   :  { %2632 = vmatpush2.bf16.msra.mxu1 %v3600_v5  ;;  %v4078_v5 = vld [vmem:[#allocation7 + $0x48] sm:$0xff]  }
 0x2ae   :  { %2675 = vmatpush2.bf16.msra.mxu0 %v3728_v6  ;;  %2633 = vmatprep.subr.bf16.mxu1 %v3593_v7  ;;  %v4094_v6 = vld [vmem:[#allocation7 + $0xc8] sm:$0xff]  }
 0x2af   :  { %2676 = vmatprep.subr.bf16.mxu0 %v3721_v8  ;;  %v4079_v8 = vld [vmem:[#allocation7 + $0x8] sm:$0xff]  }
 0x2b1   :  { %2634 = vmatpush2.bf16.msra.mxu1 %v3592_v13 }
 0x2b2   :  { %2677 = vmatpush2.bf16.msra.mxu0 %v3720_v14  ;;  %2635 = vmatprep.subr.bf16.mxu1 %v3585_v15  ;;  %v4081_v14 = vld [vmem:[#allocation7] sm:$0xff]  }
 0x2b3   :  { %2678 = vmatprep.subr.bf16.mxu0 %v3713_v16  ;;  %v4097_v16 = vld [vmem:[#allocation7 + $0x80] sm:$0xff]  }
 0x2b5   :  { %2636 = vmatpush2.bf16.msra.mxu1 %v3584_v17  ;;  %v4098_v17 = vld [vmem:[#allocation7 + $0x178] sm:$0xff]  }
 0x2b6   :  { %2679 = vmatpush2.bf16.msra.mxu0 %v3712_v18  ;;  %3844 = vmatprep.subr.bf16.mxu1 %v4066_v19  ;;  %v4114_v18 = vld [vmem:[#allocation7 + $0x1f8] sm:$0xff]  }
 0x2b7   :  { %3866 = vmatprep.subr.bf16.mxu0 %v4082_v20  ;;  %v4099_v20 = vld [vmem:[#allocation7 + $0x138] sm:$0xff]  }
 0x2b8   :  { %2638 = vmatmul.mubr.bf16.vlgmr.msra.gmra.mxu1 %v4342_v41  ;;  %v2381_v30 = vpop.f32.mrf.mxu1  ;;  %v2424_v31 = vpop.f32.mrf.mxu0  ;;  %v4071_v41 = vld [vmem:[#allocation7 + $0x28] sm:$0xff]  }
 0x2b9   :  { %2681 = vmatmul.mubr.bf16.vlgmr.msra.gmra.mxu0 %v4344_v42  ;;  %3845 = vmatpush3.bf16.msra.mxu1 %v4067_v21  ;;  %v4087_v42 = vld [vmem:[#allocation7 + $0xa8] sm:$0xff]   ;;  %v2382_v2 = vadd.f32 %v2381_v30, %v1030_v57  ;;  %v4104_v30 = vld [vmem:[#allocation7 + $0x160] sm:$0xff]  }
 0x2ba   :  { %v2383_v33 = vpop.f32.mrf.mxu1  ;;  %v2426_v34 = vpop.f32.mrf.mxu0  ;;  %3846 = vmatprep.subr.bf16.mxu1 %v4068_v23  ;;  %3867 = vmatpush3.bf16.msra.mxu0 %v4083_v24  ;;  %v4100_v23 = vld [vmem:[#allocation7 + $0x170] sm:$0xff]  }
 0x2bb   :  { %v2384_v39 = vadd.f32 %v2383_v33, %v1034_v25  ;;  %3868 = vmatprep.subr.bf16.mxu0 %v4084_v26  ;;  %v2425_v7 = vadd.f32 %v2424_v31, %v2382_v2  ;;  %v4101_v24 = vld [vmem:[#allocation7 + $0x130] sm:$0xff]   ;;  %v4103_v26 = vld [vmem:[#allocation7 + $0x128] sm:$0xff]   ;;  %v4105_v31 = vld [vmem:[#allocation7 + $0x120] sm:$0xff]  }
 0x2bc   :  { %v2385_v28 = vpop.f32.mrf.mxu1  ;;  %v2428_v38 = vpop.f32.mrf.mxu0  ;;  %v4107_v33 = vld [vmem:[#allocation7 + $0x118] sm:$0xff]  }
 0x2bd   :  { %v2427_v43 = vadd.f32 %v2426_v34, %v2384_v39  ;;  %3847 = vmatpush3.bf16.msra.mxu1 %v4069_v32  ;;  %v2386_v54 = vadd.f32 %v2385_v28, %v1030_v57  ;;  %v2691_v13 = vmul.f32 0.2, %v2425_v7  ;;  %v4106_v32 = vld [vmem:[#allocation7 + $0x158] sm:$0xff]   ;;  %v4108_v34 = vld [vmem:[#allocation7 + $0x150] sm:$0xff]   ;;  %v4111_v39 = vld [vmem:[#allocation7 + $0x108] sm:$0xff]  }
 0x2be   :  { %v2387_v44 = vpop.f32.mrf.mxu1  ;;  %3848 = vmatprep.subr.bf16.mxu1 %v4070_v35  ;;  %3869 = vmatpush3.bf16.msra.mxu0 %v4085_v36  ;;  %v2430_v47 = vpop.f32.mrf.mxu0  ;;  %v4109_v35 = vld [vmem:[#allocation7 + $0x110] sm:$0xff]   ;;  %v4110_v36 = vld [vmem:[#allocation7 + $0x148] sm:$0xff]   ;;  %v4113_v28 = vld [vmem:[#allocation7 + $0x100] sm:$0xff]  }
 0x2bf   :  { %v2388_v45 = vadd.f32 %v2387_v44, %v1034_v25  ;;  %3870 = vmatprep.subr.bf16.mxu0 %v4086_v37  ;;  %v2692_v48 = vmul.f32 0.2, %v2427_v43  ;;  %v2429_v4 = vadd.f32 %v2428_v38, %v2386_v54  ;;  %v2707_v19 = vmax.f32 %v2425_v7, %v2691_v13  ;;  %v4102_v25 = vld [vmem:[#allocation7 + $0x168] sm:$0xff]   ;;  %v4112_v37 = vld [vmem:[#allocation7 + $0x140] sm:$0xff]   ;;  %v4115_v2 = vld [vmem:[#allocation7 + $0x1b8] sm:$0xff]  }
 0x2c0   :  { %v1038_v38 = vrot.slane %v4363_v22, %v333_v59  ;;  %v4120_v7 = vld [vmem:[#allocation7 + $0x1e0] sm:$0xff]   ;;  %v4126_v13 = vld [vmem:[#allocation7 + $0x1c8] sm:$0xff]  }
 0x2c1   :  { %v2431_v49 = vadd.f32 %v2430_v47, %v2388_v45  ;;  %3849 = vmatpush3.bf16.msra.mxu1 %v4071_v41  ;;  %v2708_v60 = vmax.f32 %v2427_v43, %v2692_v48  ;;  %v2699_v9 = vmul.f32 0.2, %v2429_v4  ;;  %v1042_v43 = vrot.slane %v4363_v22, %v337_v58 }
 0x2c2   :  { %3850 = vmatprep.subr.bf16.mxu1 %v4072_v40  ;;  %3871 = vmatpush3.bf16.msra.mxu0 %v4087_v42 }
 0x2c3   :  { %v2700_v53 = vmul.f32 0.2, %v2431_v49  ;;  %3872 = vmatprep.subr.bf16.mxu0 %v4088_v46  ;;  %v2715_v15 = vmax.f32 %v2429_v4, %v2699_v9  ;;  %v4116_v4 = vld [vmem:[#allocation7 + $0x1f0] sm:$0xff]   ;;  %v4122_v9 = vld [vmem:[#allocation7 + $0x1d8] sm:$0xff]  }
 0x2c5   :  { %v2716_v61 = vmax.f32 %v2431_v49, %v2700_v53  ;;  %3851 = vmatpush3.bf16.msra.mxu1 %v4073_v50  ;;  %v2723_v21 = vpack.c.bf16 %v2715_v15, %v2707_v19  ;;  %v4128_v15 = vld [vmem:[#allocation7 + $0x1c0] sm:$0xff]  }
 0x2c6   :  { %3852 = vmatprep.subr.bf16.mxu1 %v4074_v51  ;;  %3873 = vmatpush3.bf16.msra.mxu0 %v4089_v52 }
 0x2c7   :  { %v2724_v0 = vpack.c.bf16 %v2716_v61, %v2708_v60  ;;  %3874 = vmatprep.subr.bf16.mxu0 %v4090_v56 }
 0x2c9   :  { %3853 = vmatpush3.bf16.msra.mxu1 %v4075_v62  ;;  %3282 = vmatprep.mubr.bf16.mxu1 %v2724_v0 }
 0x2ca   :  { %3854 = vmatprep.subr.bf16.mxu1 %v4076_v55  ;;  %3875 = vmatpush3.bf16.msra.mxu0 %v4091_v63 }
 0x2cb   :  { %3876 = vmatprep.subr.bf16.mxu0 %v4092_v1 }
 0x2cd   :  { %3855 = vmatpush3.bf16.msra.mxu1 %v4077_v3 }
 0x2ce   :  { %3856 = vmatprep.subr.bf16.mxu1 %v4078_v5  ;;  %3877 = vmatpush3.bf16.msra.mxu0 %v4093_v29  ;;  %v4117_v5 = vld [vmem:[#allocation7 + $0x1b0] sm:$0xff]   ;;  %v4118_v29 = vld [vmem:[#allocation7 + $0x1e8] sm:$0xff]  }
 0x2cf   :  { %3878 = vmatprep.subr.bf16.mxu0 %v4094_v6  ;;  %v4119_v6 = vld [vmem:[#allocation7 + $0x1a8] sm:$0xff]  }
 0x2d1   :  { %3857 = vmatpush3.bf16.msra.mxu1 %v4079_v8  ;;  %v4121_v8 = vld [vmem:[#allocation7 + $0x1a0] sm:$0xff]  }
 0x2d2   :  { %3858 = vmatprep.subr.bf16.mxu1 %v4080_v10  ;;  %3879 = vmatpush3.bf16.msra.mxu0 %v4095_v11  ;;  %v4123_v10 = vld [vmem:[#allocation7 + $0x198] sm:$0xff]   ;;  %v4124_v11 = vld [vmem:[#allocation7 + $0x1d0] sm:$0xff]  }
 0x2d3   :  { %3880 = vmatprep.subr.bf16.mxu0 %v4096_v12  ;;  %v4125_v12 = vld [vmem:[#allocation7 + $0x190] sm:$0xff]  }
 0x2d5   :  { %3859 = vmatpush3.bf16.msra.mxu1 %v4081_v14  ;;  %v4127_v14 = vld [vmem:[#allocation7 + $0x188] sm:$0xff]  }
 0x2d6   :  { %3881 = vmatpush3.bf16.msra.mxu0 %v4097_v16  ;;  %3888 = vmatprep.subr.bf16.mxu1 %v4098_v17  ;;  %v4129_v16 = vld [vmem:[#allocation7 + $0x180] sm:$0xff]   ;;  %v1045_v17 = vsub.s32 4, %v4298_v27 }
 0x2d7   :  { %3910 = vmatprep.subr.bf16.mxu0 %v4114_v18  ;;  %v1049_v18 = vsub.s32 5, %v4298_v27 }
 0x2d8   :  { %3283 = vmatmul.mubr.bf16.vlgmr.msra.gmra.mxu1 %v2723_v21  ;;  %v1046_v19 = vrot.slane %v4363_v22, %v1045_v17 }
 0x2d9   :  { %3889 = vmatpush3.bf16.msra.mxu1 %v4099_v20  ;;  %v1050_v20 = vrot.slane %v4363_v22, %v1049_v18 }
 0x2da   :  { %3890 = vmatprep.subr.bf16.mxu1 %v4100_v23 }
 0x2dd   :  { %3891 = vmatpush3.bf16.msra.mxu1 %v4101_v24 }
 0x2de   :  { %3892 = vmatprep.subr.bf16.mxu1 %v4102_v25 }
 0x2e1   :  { %3893 = vmatpush3.bf16.msra.mxu1 %v4103_v26 }
 0x2e2   :  { %3894 = vmatprep.subr.bf16.mxu1 %v4104_v30 }
 0x2e5   :  { %3895 = vmatpush3.bf16.msra.mxu1 %v4105_v31 }
 0x2e6   :  { %3896 = vmatprep.subr.bf16.mxu1 %v4106_v32 }
 0x2e9   :  { %3897 = vmatpush3.bf16.msra.mxu1 %v4107_v33 }
 0x2ea   :  { %3898 = vmatprep.subr.bf16.mxu1 %v4108_v34 }
 0x2ed   :  { %3899 = vmatpush3.bf16.msra.mxu1 %v4109_v35 }
 0x2ee   :  { %3900 = vmatprep.subr.bf16.mxu1 %v4110_v36 }
 0x2f1   :  { %3901 = vmatpush3.bf16.msra.mxu1 %v4111_v39 }
 0x2f2   :  { %3902 = vmatprep.subr.bf16.mxu1 %v4112_v37 }
 0x2f5   :  { %3903 = vmatpush3.bf16.msra.mxu1 %v4113_v28 }
 0x2f8   :  { %v2467_v41 = vpop.f32.mrf.mxu1  ;;  %v2510_v44 = vpop.f32.mrf.mxu0 }
 0x2f9   :  { %v2468_v40 = vadd.f32 %v2467_v41, %v1038_v38 }
 0x2fa   :  { %v2469_v42 = vpop.f32.mrf.mxu1  ;;  %v2512_v45 = vpop.f32.mrf.mxu0 }
 0x2fb   :  { %v2470_v46 = vadd.f32 %v2469_v42, %v1042_v43  ;;  %v2511_v51 = vadd.f32 %v2510_v44, %v2468_v40 }
 0x2fc   :  { %v2471_v47 = vpop.f32.mrf.mxu1  ;;  %v2514_v48 = vpop.f32.mrf.mxu0 }
 0x2fd   :  { %v2513_v49 = vadd.f32 %v2512_v45, %v2470_v46  ;;  %v2472_v50 = vadd.f32 %v2471_v47, %v1038_v38  ;;  %v2693_v62 = vmul.f32 0.2, %v2511_v51 }
 0x2fe   :  { %v2473_v52 = vpop.f32.mrf.mxu1  ;;  %v2516_v57 = vpop.f32.mrf.mxu0 }
 0x2ff   :  { %v2515_v53 = vadd.f32 %v2514_v48, %v2472_v50  ;;  %v2474_v56 = vadd.f32 %v2473_v52, %v1042_v43  ;;  %v2694_v59 = vmul.f32 0.2, %v2513_v49  ;;  %v2709_v0 = vmax.f32 %v2511_v51, %v2693_v62 }
 0x300   :  { %v1053_v50 = vsub.s32 6, %v4298_v27  ;;  %v1057_v51 = vsub.s32 7, %v4298_v27 }
 0x301   :  { %v2701_v60 = vmul.f32 0.2, %v2515_v53  ;;  %v2517_v61 = vadd.f32 %v2516_v57, %v2474_v56  ;;  %v2710_v55 = vmax.f32 %v2513_v49, %v2694_v59 }
 0x302   :  { %v1054_v52 = vrot.slane %v4363_v22, %v1053_v50 }
 0x303   :  { %v2702_v58 = vmul.f32 0.2, %v2517_v61  ;;  %v2717_v54 = vmax.f32 %v2515_v53, %v2701_v60  ;;  %v1058_v53 = vrot.slane %v4363_v22, %v1057_v51 }
 0x305   :  { %v2718_v63 = vmax.f32 %v2517_v61, %v2702_v58  ;;  %v2725_v3 = vpack.c.bf16 %v2717_v54, %v2709_v0 }
 0x307   :  { %v2726_v1 = vpack.c.bf16 %v2718_v63, %v2710_v55 }
 0x309   :  { %3323 = vmatprep.mubr.bf16.mxu0 %v2726_v1 }
 0x30a   :  { %3324 = vmatmul.mubr.bf16.vlgmr.msra.gmra.mxu0 %v2725_v3 }
 0x30b   :  { %3911 = vmatpush3.bf16.msra.mxu0 %v4115_v2 }
 0x30c   :  { %3912 = vmatprep.subr.bf16.mxu0 %v4116_v4 }
 0x30f   :  { %3913 = vmatpush3.bf16.msra.mxu0 %v4117_v5 }
 0x310   :  { %3914 = vmatprep.subr.bf16.mxu0 %v4118_v29 }
 0x313   :  { %3915 = vmatpush3.bf16.msra.mxu0 %v4119_v6 }
 0x314   :  { %3916 = vmatprep.subr.bf16.mxu0 %v4120_v7 }
 0x317   :  { %3917 = vmatpush3.bf16.msra.mxu0 %v4121_v8 }
 0x318   :  { %3918 = vmatprep.subr.bf16.mxu0 %v4122_v9 }
 0x31b   :  { %3919 = vmatpush3.bf16.msra.mxu0 %v4123_v10 }
 0x31c   :  { %3920 = vmatprep.subr.bf16.mxu0 %v4124_v11 }
 0x31f   :  { %3921 = vmatpush3.bf16.msra.mxu0 %v4125_v12 }
 0x320   :  { %3922 = vmatprep.subr.bf16.mxu0 %v4126_v13 }
 0x323   :  { %3923 = vmatpush3.bf16.msra.mxu0 %v4127_v14 }
 0x324   :  { %3924 = vmatprep.subr.bf16.mxu0 %v4128_v15 }
 0x327   :  { %3925 = vmatpush3.bf16.msra.mxu0 %v4129_v16 }
 0x338   :  { %v2553_v21 = vpop.f32.mrf.mxu1 }
 0x339   :  { %v2596_v23 = vpop.f32.mrf.mxu0  ;;  %v2554_v24 = vadd.f32 %v2553_v21, %v1046_v19 }
 0x33a   :  { %v2555_v25 = vpop.f32.mrf.mxu1 }
 0x33b   :  { %v2556_v26 = vadd.f32 %v2555_v25, %v1050_v20  ;;  %v2598_v30 = vpop.f32.mrf.mxu0  ;;  %v2597_v35 = vadd.f32 %v2596_v23, %v2554_v24  ;;  %v3770_v25 = vld [vmem:[%s4399_s8] ss:$0 sm:$0xff] }
 0x33c   :  { %v2557_v31 = vpop.f32.mrf.mxu1 }
 0x33d   :  { %v2599_v32 = vadd.f32 %v2598_v30, %v2556_v26  ;;  %v2558_v33 = vadd.f32 %v2557_v31, %v1046_v19  ;;  %v2600_v34 = vpop.f32.mrf.mxu0  ;;  %v2695_v44 = vmul.f32 0.2, %v2597_v35 }
 0x33e   :  { %v2559_v36 = vpop.f32.mrf.mxu1 }
 0x33f   :  { %v2601_v39 = vadd.f32 %v2600_v34, %v2558_v33  ;;  %v2560_v37 = vadd.f32 %v2559_v36, %v1050_v20  ;;  %v2602_v28 = vpop.f32.mrf.mxu0  ;;  %v2696_v38 = vmul.f32 0.2, %v2599_v32  ;;  %v2711_v47 = vmax.f32 %v2597_v35, %v2695_v44 }
 0x341   :  { %v2703_v43 = vmul.f32 0.2, %v2601_v39  ;;  %v2603_v41 = vadd.f32 %v2602_v28, %v2560_v37  ;;  %v2712_v45 = vmax.f32 %v2599_v32, %v2696_v38 }
 0x343   :  { %v2704_v40 = vmul.f32 0.2, %v2603_v41  ;;  %v2719_v42 = vmax.f32 %v2601_v39, %v2703_v43 }
 0x345   :  { %v2720_v46 = vmax.f32 %v2603_v41, %v2704_v40  ;;  %v2727_v49 = vpack.c.bf16 %v2719_v42, %v2711_v47 }
 0x347   :  { %v2728_v48 = vpack.c.bf16 %v2720_v46, %v2712_v45 }
 0x349   :  { %3364 = vmatprep.mubr.bf16.mxu1 %v2728_v48 }
 0x34a   :  { %3365 = vmatmul.mubr.bf16.vlgmr.msra.gmra.mxu1 %v2727_v49 }
 0x378   :  { %v2639_v56 = vpop.f32.mrf.mxu1 }
 0x379   :  { %v2682_v57 = vpop.f32.mrf.mxu0  ;;  %v2640_v59 = vadd.f32 %v2639_v56, %v1054_v52 }
 0x37a   :  { %v2641_v60 = vpop.f32.mrf.mxu1 }
 0x37b   :  { %v2642_v61 = vadd.f32 %v2641_v60, %v1058_v53  ;;  %v2684_v62 = vpop.f32.mrf.mxu0  ;;  %v2683_v0 = vadd.f32 %v2682_v57, %v2640_v59 }
 0x37c   :  { %v2643_v58 = vpop.f32.mrf.mxu1 }
 0x37d   :  { %v2685_v54 = vadd.f32 %v2684_v62, %v2642_v61  ;;  %v2644_v55 = vadd.f32 %v2643_v58, %v1054_v52  ;;  %v2686_v63 = vpop.f32.mrf.mxu0  ;;  %v2697_v6 = vmul.f32 0.2, %v2683_v0 }
 0x37e   :  { %v2645_v1 = vpop.f32.mrf.mxu1 }
 0x37f   :  { %v2687_v2 = vadd.f32 %v2686_v63, %v2644_v55  ;;  %v2646_v3 = vadd.f32 %v2645_v1, %v1058_v53  ;;  %v2688_v4 = vpop.f32.mrf.mxu0  ;;  %v2698_v27 = vmul.f32 0.2, %v2685_v54  ;;  %v2713_v10 = vmax.f32 %v2683_v0, %v2697_v6 }
 0x381   :  { %v2705_v5 = vmul.f32 0.2, %v2687_v2  ;;  %v2689_v29 = vadd.f32 %v2688_v4, %v2646_v3  ;;  %v2714_v8 = vmax.f32 %v2685_v54, %v2698_v27 }
 0x383   :  { %v2706_v22 = vmul.f32 0.2, %v2689_v29  ;;  %v2721_v7 = vmax.f32 %v2687_v2, %v2705_v5 }
 0x385   :  { %v2722_v9 = vmax.f32 %v2689_v29, %v2706_v22  ;;  %v2729_v12 = vpack.c.bf16 %v2721_v7, %v2713_v10 }
 0x387   :  { %v2730_v11 = vpack.c.bf16 %v2722_v9, %v2714_v8 }
 0x389   :  { %3405 = vmatprep.mubr.bf16.mxu0 %v2730_v11 }
 0x38a   :  { %3406 = vmatmul.mubr.bf16.vlgmr.msra.gmra.mxu0 %v2729_v12 }
 0x398   :  { %v3860_v13 = vpop.f32.mrf.mxu1 }
 0x39a   :  { %v3861_v14 = vpop.f32.mrf.mxu1 }
 0x39b   :  { %v3862_v23 = vadd.f32 %v3861_v14, %v3860_v13 }
 0x39c   :  { %v3863_v15 = vpop.f32.mrf.mxu1 }
 0x39d   :  { %v3285_v32 = vadd.f32 %v3862_v23, %v3770_v25 }
 0x39e   :  { %v3864_v16 = vpop.f32.mrf.mxu1 }
 0x39f   :  { %v3865_v31 = vadd.f32 %v3864_v16, %v3863_v15 }
 0x3a1   :  { %v3288_v28 = vadd.f32 %v3865_v31, %v3770_v25 }
 0x3ca   :  { %v3882_v17 = vpop.f32.mrf.mxu0 }
 0x3cc   :  { %v3883_v19 = vpop.f32.mrf.mxu0 }
 0x3cd   :  { %v3884_v26 = vadd.f32 %v3883_v19, %v3882_v17 }
 0x3ce   :  { %v3885_v21 = vpop.f32.mrf.mxu0 }
 0x3cf   :  { %v3326_v39 = vadd.f32 %v3884_v26, %v3285_v32 }
 0x3d0   :  { %v3886_v30 = vpop.f32.mrf.mxu0 }
 0x3d1   :  { %v3887_v36 = vadd.f32 %v3886_v30, %v3885_v21 }
 0x3d3   :  { %v3329_v40 = vadd.f32 %v3887_v36, %v3288_v28 }
 0x40a   :  { %v3904_v18 = vpop.f32.mrf.mxu1 }
 0x40c   :  { %v3905_v20 = vpop.f32.mrf.mxu1 }
 0x40d   :  { %v3906_v33 = vadd.f32 %v3905_v20, %v3904_v18 }
 0x40e   :  { %v3907_v24 = vpop.f32.mrf.mxu1 }
 0x40f   :  { %v3367_v41 = vadd.f32 %v3906_v33, %v3326_v39 }
 0x410   :  { %v3908_v34 = vpop.f32.mrf.mxu1 }
 0x411   :  { %v3909_v38 = vadd.f32 %v3908_v34, %v3907_v24 }
 0x413   :  { %v3370_v46 = vadd.f32 %v3909_v38, %v3329_v40 }
 0x44a   :  { %v3926_v35 = vpop.f32.mrf.mxu0 }
 0x44c   :  { %v3927_v37 = vpop.f32.mrf.mxu0 }
 0x44d   :  { %v3928_v43 = vadd.f32 %v3927_v37, %v3926_v35 }
 0x44e   :  { %v3929_v44 = vpop.f32.mrf.mxu0 }
 0x44f   :  { %v3408_v42 = vadd.f32 %v3928_v43, %v3367_v41 }
 0x450   :  { %v3930_v45 = vpop.f32.mrf.mxu0 }
 0x451   :  { %v3931_v47 = vadd.f32 %v3930_v45, %v3929_v44  ;;  %4130 = vtanh.f32 %v3408_v42 }
 0x453   :  { %v3411_v48 = vadd.f32 %v3931_v47, %v3370_v46 }
 0x455   :  { %4132 = vtanh.f32 %v3411_v48 }
 0x45e   :  { %v4131_v49 = vpop.eup %4130 }
 0x462   :  { %v4133_v50 = vpop.eup %4132 }
 0x463   :  { %v3842_v51 = vpack.c.bf16 %v4133_v50, %v4131_v49 }
 0x465   :  { %3843 = vst [vmem:[%s4400_s9] sm:$0xff] %v3842_v51  }
 0x466   :  { %3430 = vsyncpa [#allocation3], 1 }
 0x467   :  { %3431 = vsyncpa [#allocation5], 1 }
 0x468   :  { %3432 = vsyncpa [#allocation8], 1 }

</bundles_post_ra>
